<compile_context>
chip_gen: v6e
topology: v6e:2x2x1
jax: 0.10.0
libtpu: 0.0.40
codegen_flags: <defaults>
</compile_context>

<pallas_src>
import math

import numpy as np
import jax
import jax.numpy as jnp
from jax.experimental import pallas as pl
from jax.experimental.pallas import tpu as pltpu

K_NEIGHBORS = 16


def _graph_pool_kernel(idx_ref, xc_ref, xt_ref, o_ref, acc_ref):
    """One grid step == (batch b, point-tile t, contraction-chunk c).

    idx_ref : (1, K, TN)  int32        neighbor ids (k-major) for this tile
    xc_ref  : (1, Cp, NC) compute-dt   contraction chunk of the features
    xt_ref  : (1, Cp, TN) compute-dt   this tile's own features
    o_ref   : (1, Cp, TN) out-dt       pooled output tile
    acc_ref : (K, Cp, TN) f32          per-neighbor gather accumulators
    """
    c = pl.program_id(2)
    n_chunks = pl.num_programs(2)
    k_nbrs = idx_ref.shape[1]
    nc = xc_ref.shape[2]

    @pl.when(c == 0)
    def _init():
        acc_ref[...] = jnp.zeros_like(acc_ref)

    x_chunk = xc_ref[0]                                               # (Cp, NC)
    idx = idx_ref[0]                                                  # (K, TN)
    base = c * nc
    row = jax.lax.broadcasted_iota(jnp.int32, (nc, 1), 0) + base      # (NC, 1)

    # K one-hot gathers for this chunk of source points. Each dot is
    # (Cp, NC) @ (NC, TN) -> (Cp, TN): output lanes = point tile (lane-dense),
    # accumulation in f32. Exact, since every one-hot column has exactly one
    # nonzero across all chunks and padded x columns are never selected.
    for k in range(k_nbrs):
        onehot_k = (row == idx[k:k + 1, :]).astype(x_chunk.dtype)     # (NC, TN)
        acc_ref[k] += jnp.dot(x_chunk, onehot_k,
                              preferred_element_type=jnp.float32)

    @pl.when(c == n_chunks - 1)
    def _finalize():
        pooled = acc_ref[0]                                           # (Cp, TN)
        for k in range(1, k_nbrs):
            pooled = jnp.maximum(pooled, acc_ref[k])
        pooled = jnp.maximum(pooled, xt_ref[0].astype(jnp.float32))
        o_ref[0] = pooled.astype(o_ref.dtype)


def graph_pooling(x, batch_graph, *, seed=0, tile_n=256, chunk_n=256,
                  compute_dtype=None):
    """x: (B, C, N) float; batch_graph: (B, N, N) {0,1} adjacency.

    Returns (pooled (B, C, N), aa (B, N, K) sampled neighbor indices).
    """
    B, C, N = x.shape
    K = K_NEIGHBORS
    if compute_dtype is None:
        compute_dtype = x.dtype
    compute_dtype = jnp.dtype(compute_dtype)

    # ---- host-side neighbor sampling (vectorized) --------------------------
    # TODO(synk): the random neighbor sampling from adjacency nonzeros is
    # inherently host-side / data-dependent (as in the original PyTorch
    # module). Vectorized: uniform random keys masked by the adjacency row,
    # top-K per row == uniform K-subset without replacement. Note: a fresh
    # rng(seed) per call resamples the same neighbors on repeated calls.
    rng = np.random.default_rng(seed)
    graph_np = np.asarray(batch_graph) > 0
    counts = graph_np.sum(axis=-1)
    if counts.min() < K:
        raise ValueError(
            f"every point needs >= {K} neighbors; min found {int(counts.min())}")
    keys = rng.random(graph_np.shape, dtype=np.float32)
    keys = np.where(graph_np, keys, -1.0)
    aa = np.argpartition(-keys, K - 1, axis=-1)[..., :K].astype(np.int32)  # (B,N,K)

    # ---- tiling parameters --------------------------------------------------
    def rup(v, m):
        return -(-v // m) * m

    TN = rup(max(1, min(tile_n, N)), 128)     # output point tile (lane dim)
    NC = rup(max(1, min(chunk_n, N)), 128)    # contraction chunk of points
    N_pad = rup(N, math.lcm(TN, NC))
    Cp = rup(C, 8)                            # channels are the sublane dim
    n_tiles = N_pad // TN
    n_chunks = N_pad // NC

    # ---- kernel-friendly layouts --------------------------------------------
    # x stays channel-major (matches the module's (B, C, N)); pad C->Cp, N->N_pad.
    x_p = jnp.pad(x.astype(compute_dtype),
                  ((0, 0), (0, Cp - C), (0, N_pad - N)))
    # idx: k-major, lane-dense over points. Padded points get index 0 — their
    # (garbage) output rows are sliced off after the call.
    aa_pad = np.zeros((B, N_pad, K), np.int32)
    aa_pad[:, :N, :] = aa
    idx = jnp.asarray(np.transpose(aa_pad, (0, 2, 1)))               # (B, K, N_pad)

    # ---- VMEM budget (N-independent thanks to chunking) ----------------------
    cdt = compute_dtype.itemsize
    odt = jnp.dtype(x.dtype).itemsize
    needed = (2 * K * TN * 4            # idx blocks (double-buffered)
              + 2 * Cp * NC * cdt       # x contraction-chunk blocks
              + 2 * Cp * TN * cdt       # x self-tile blocks
              + 2 * Cp * TN * odt       # output blocks
              + K * Cp * TN * 4         # f32 accumulator scratch
              + 4 * NC * TN * cdt)      # live one-hot slabs
    vmem_limit = max(2 * needed + (8 << 20), 32 << 20)
    try:
        cap = pltpu.get_tpu_info().vmem_capacity_bytes
        vmem_limit = min(vmem_limit, max(cap - (16 << 20), cap // 2))
    except Exception:
        vmem_limit = min(vmem_limit, 48 << 20)
    vmem_limit = int(vmem_limit)

    out = pl.pallas_call(
        _graph_pool_kernel,
        out_shape=jax.ShapeDtypeStruct((B, Cp, N_pad), x.dtype),
        grid_spec=pltpu.PrefetchScalarGridSpec(
            num_scalar_prefetch=0,
            grid=(B, n_tiles, n_chunks),
            in_specs=[
                # neighbor indices for this point tile (constant over c)
                pl.BlockSpec((1, K, TN), lambda b, t, c: (b, 0, t)),
                # contraction chunk of the features (varies with c)
                pl.BlockSpec((1, Cp, NC), lambda b, t, c: (b, 0, c)),
                # the tile's own features for the final max (constant over c)
                pl.BlockSpec((1, Cp, TN), lambda b, t, c: (b, 0, t)),
            ],
            out_specs=pl.BlockSpec((1, Cp, TN), lambda b, t, c: (b, 0, t)),
            scratch_shapes=[pltpu.VMEM((K, Cp, TN), jnp.float32)],
        ),
        compiler_params=pltpu.CompilerParams(
            dimension_semantics=("parallel", "parallel", "arbitrary"),
            vmem_limit_bytes=vmem_limit,
        ),
    )(idx, x_p, x_p)

    return out[:, :C, :N], aa


def _reference(x, aa):
    """Pure-numpy reference matching the PyTorch forward given the same idx."""
    x = np.asarray(x)
    B, C, N = x.shape
    out = np.zeros_like(x)
    for b in range(B):
        xb = x[b].T                                 # (N, C)
        gathered = xb[aa[b]]                        # (N, K, C)
        out[b] = gathered.max(axis=1).T             # (C, N)
    return np.maximum(out, x)


if __name__ == "__main__":
    # Small shapes consistent with the module (graph pooling runs at C=64/128).
    B, C, N = 2, 64, 64

    key = jax.random.PRNGKey(0)
    x = jax.random.normal(key, (B, C, N), dtype=jnp.float32)
    # Make the toy inputs exactly bf16-representable so the correctness check
    # is independent of the MXU's internal f32/bf16 decomposition (the gather
    # itself is exact for any such input in both compute paths).
    x = x.astype(jnp.bfloat16).astype(jnp.float32)

    # Deterministic adjacency: fully connected minus self-loops, so every
    # point has >= 16 neighbors (required by replace=False sampling).
    adj = np.ones((B, N, N), dtype=np.float32)
    for b in range(B):
        np.fill_diagonal(adj[b], 0.0)

    ok = True
    for cdt in (jnp.bfloat16, jnp.float32):
        out, aa = graph_pooling(x, adj, seed=0, compute_dtype=cdt)
        out = jax.block_until_ready(out)
        ref = _reference(np.asarray(x), aa)
        np.testing.assert_allclose(np.asarray(out), ref, rtol=1e-5, atol=1e-5)

    if ok:
        print("KERNEL_OK")
</pallas_src>

<mosaic_0001>
module attributes {stable_mosaic.version = 11 : i64} {
  func.func @_graph_pool_kernel(%arg0: i32, %arg1: i32, %arg2: i32, %arg3: memref<1x16x128xi32, #tpu.memory_space<vmem>>, %arg4: memref<1x64x128xbf16, #tpu.memory_space<vmem>>, %arg5: memref<1x64x128xbf16, #tpu.memory_space<vmem>>, %arg6: memref<1x64x128xf32, #tpu.memory_space<vmem>>, %arg7: memref<16x64x128xf32, #tpu.memory_space<vmem>>) attributes {dimension_semantics = [#tpu.dimension_semantics<parallel>, #tpu.dimension_semantics<parallel>, #tpu.dimension_semantics<arbitrary>], iteration_bounds = array<i64: 2, 1, 1>, scalar_prefetch = 0 : i64, scratch_operands = 1 : i64, tpu.core_type = #tpu.core_type<tc>, window_params = [{transform_indices = @transform_0, window_bounds = array<i64: 1, 16, 128>}, {transform_indices = @transform_1, window_bounds = array<i64: 1, 64, 128>}, {transform_indices = @transform_2, window_bounds = array<i64: 1, 64, 128>}, {transform_indices = @transform_3, window_bounds = array<i64: 1, 64, 128>}]} {
    %c0_i32 = arith.constant 0 : i32
    %0 = arith.cmpi eq, %arg2, %c0_i32 : i32
    %1 = arith.extui %0 : i1 to i32
    %c0_i32_0 = arith.constant 0 : i32
    %2 = arith.cmpi ne, %1, %c0_i32_0 : i32
    scf.if %2 {
      %cst_104 = arith.constant 0.000000e+00 : f32
      %238 = vector.broadcast %cst_104 : f32 to vector<16x64x128xf32>
      %c0_105 = arith.constant 0 : index
      %c0_106 = arith.constant 0 : index
      %c0_107 = arith.constant 0 : index
      %239 = vector.load %arg7[%c0_105, %c0_106, %c0_107] : memref<16x64x128xf32, #tpu.memory_space<vmem>>, vector<16x64x128xf32>
      tpu.vector_store %arg7[%c0_105, %c0_106, %c0_107], %238 {strides = array<i32>} : memref<16x64x128xf32, #tpu.memory_space<vmem>>, vector<16x64x128xf32>,
    } else {
    }
    %c0 = arith.constant 0 : index
    %c0_1 = arith.constant 0 : index
    %c0_2 = arith.constant 0 : index
    %3 = vector.load %arg4[%c0, %c0_1, %c0_2] : memref<1x64x128xbf16, #tpu.memory_space<vmem>>, vector<1x64x128xbf16>
    %4 = vector.shape_cast %3 : vector<1x64x128xbf16> to vector<64x128xbf16>
    %c0_3 = arith.constant 0 : index
    %c0_4 = arith.constant 0 : index
    %c0_5 = arith.constant 0 : index
    %5 = vector.load %arg3[%c0_3, %c0_4, %c0_5] : memref<1x16x128xi32, #tpu.memory_space<vmem>>, vector<1x16x128xi32>
    %6 = vector.shape_cast %5 : vector<1x16x128xi32> to vector<16x128xi32>
    %c128_i32 = arith.constant 128 : i32
    %7 = arith.muli %arg2, %c128_i32 : i32
    %8 = tpu.iota {dimensions = array<i32: 0>} : vector<128x1xi32>
    %9 = vector.broadcast %7 : i32 to vector<128x1xi32>
    %10 = arith.addi %8, %9 : vector<128x1xi32>
    %11 = vector.extract_strided_slice %6 {offsets = [0, 0], sizes = [1, 128], strides = [1, 1]} : vector<16x128xi32> to vector<1x128xi32>
    %12 = vector.broadcast %10 : vector<128x1xi32> to vector<128x128xi32>
    %13 = vector.broadcast %11 : vector<1x128xi32> to vector<128x128xi32>
    %14 = arith.cmpi eq, %12, %13 : vector<128x128xi32>
    %15 = arith.extui %14 : vector<128x128xi1> to vector<128x128xi32>
    %16 = arith.sitofp %15 : vector<128x128xi32> to vector<128x128xf32>
    %17 = arith.truncf %16 : vector<128x128xf32> to vector<128x128xbf16>
    %c0_6 = arith.constant 0 : index
    %c0_7 = arith.constant 0 : index
    %c0_8 = arith.constant 0 : index
    %18 = vector.load %arg7[%c0_6, %c0_7, %c0_8] : memref<16x64x128xf32, #tpu.memory_space<vmem>>, vector<1x64x128xf32>
    %19 = vector.shape_cast %18 : vector<1x64x128xf32> to vector<64x128xf32>
    %cst = arith.constant dense<0.000000e+00> : vector<64x128xf32>
    %20 = tpu.matmul %4, %17, %cst {dimension_numbers = #tpu.dot_dimension_numbers<[1], [0], [0], [1], [0, 0, 1, 1], [], []>} : vector<64x128xbf16>, vector<128x128xbf16>, vector<64x128xf32> -> vector<64x128xf32>
    %21 = arith.addf %19, %20 : vector<64x128xf32>
    %c0_9 = arith.constant 0 : index
    %c0_10 = arith.constant 0 : index
    %c0_11 = arith.constant 0 : index
    %22 = vector.load %arg7[%c0_9, %c0_10, %c0_11] : memref<16x64x128xf32, #tpu.memory_space<vmem>>, vector<1x64x128xf32>
    %23 = vector.shape_cast %22 : vector<1x64x128xf32> to vector<64x128xf32>
    %24 = vector.shape_cast %21 : vector<64x128xf32> to vector<1x64x128xf32>
    tpu.vector_store %arg7[%c0_9, %c0_10, %c0_11], %24 {strides = array<i32>} : memref<16x64x128xf32, #tpu.memory_space<vmem>>, vector<1x64x128xf32>,
    %25 = vector.extract_strided_slice %6 {offsets = [1, 0], sizes = [1, 128], strides = [1, 1]} : vector<16x128xi32> to vector<1x128xi32>
    %26 = vector.broadcast %10 : vector<128x1xi32> to vector<128x128xi32>
    %27 = vector.broadcast %25 : vector<1x128xi32> to vector<128x128xi32>
    %28 = arith.cmpi eq, %26, %27 : vector<128x128xi32>
    %29 = arith.extui %28 : vector<128x128xi1> to vector<128x128xi32>
    %30 = arith.sitofp %29 : vector<128x128xi32> to vector<128x128xf32>
    %31 = arith.truncf %30 : vector<128x128xf32> to vector<128x128xbf16>
    %c1 = arith.constant 1 : index
    %c0_12 = arith.constant 0 : index
    %c0_13 = arith.constant 0 : index
    %32 = vector.load %arg7[%c1, %c0_12, %c0_13] : memref<16x64x128xf32, #tpu.memory_space<vmem>>, vector<1x64x128xf32>
    %33 = vector.shape_cast %32 : vector<1x64x128xf32> to vector<64x128xf32>
    %cst_14 = arith.constant dense<0.000000e+00> : vector<64x128xf32>
    %34 = tpu.matmul %4, %31, %cst_14 {dimension_numbers = #tpu.dot_dimension_numbers<[1], [0], [0], [1], [0, 0, 1, 1], [], []>} : vector<64x128xbf16>, vector<128x128xbf16>, vector<64x128xf32> -> vector<64x128xf32>
    %35 = arith.addf %33, %34 : vector<64x128xf32>
    %c1_15 = arith.constant 1 : index
    %c0_16 = arith.constant 0 : index
    %c0_17 = arith.constant 0 : index
    %36 = vector.load %arg7[%c1_15, %c0_16, %c0_17] : memref<16x64x128xf32, #tpu.memory_space<vmem>>, vector<1x64x128xf32>
    %37 = vector.shape_cast %36 : vector<1x64x128xf32> to vector<64x128xf32>
    %38 = vector.shape_cast %35 : vector<64x128xf32> to vector<1x64x128xf32>
    tpu.vector_store %arg7[%c1_15, %c0_16, %c0_17], %38 {strides = array<i32>} : memref<16x64x128xf32, #tpu.memory_space<vmem>>, vector<1x64x128xf32>,
    %39 = vector.extract_strided_slice %6 {offsets = [2, 0], sizes = [1, 128], strides = [1, 1]} : vector<16x128xi32> to vector<1x128xi32>
    %40 = vector.broadcast %10 : vector<128x1xi32> to vector<128x128xi32>
    %41 = vector.broadcast %39 : vector<1x128xi32> to vector<128x128xi32>
    %42 = arith.cmpi eq, %40, %41 : vector<128x128xi32>
    %43 = arith.extui %42 : vector<128x128xi1> to vector<128x128xi32>
    %44 = arith.sitofp %43 : vector<128x128xi32> to vector<128x128xf32>
    %45 = arith.truncf %44 : vector<128x128xf32> to vector<128x128xbf16>
    %c2 = arith.constant 2 : index
    %c0_18 = arith.constant 0 : index
    %c0_19 = arith.constant 0 : index
    %46 = vector.load %arg7[%c2, %c0_18, %c0_19] : memref<16x64x128xf32, #tpu.memory_space<vmem>>, vector<1x64x128xf32>
    %47 = vector.shape_cast %46 : vector<1x64x128xf32> to vector<64x128xf32>
    %cst_20 = arith.constant dense<0.000000e+00> : vector<64x128xf32>
    %48 = tpu.matmul %4, %45, %cst_20 {dimension_numbers = #tpu.dot_dimension_numbers<[1], [0], [0], [1], [0, 0, 1, 1], [], []>} : vector<64x128xbf16>, vector<128x128xbf16>, vector<64x128xf32> -> vector<64x128xf32>
    %49 = arith.addf %47, %48 : vector<64x128xf32>
    %c2_21 = arith.constant 2 : index
    %c0_22 = arith.constant 0 : index
    %c0_23 = arith.constant 0 : index
    %50 = vector.load %arg7[%c2_21, %c0_22, %c0_23] : memref<16x64x128xf32, #tpu.memory_space<vmem>>, vector<1x64x128xf32>
    %51 = vector.shape_cast %50 : vector<1x64x128xf32> to vector<64x128xf32>
    %52 = vector.shape_cast %49 : vector<64x128xf32> to vector<1x64x128xf32>
    tpu.vector_store %arg7[%c2_21, %c0_22, %c0_23], %52 {strides = array<i32>} : memref<16x64x128xf32, #tpu.memory_space<vmem>>, vector<1x64x128xf32>,
    %53 = vector.extract_strided_slice %6 {offsets = [3, 0], sizes = [1, 128], strides = [1, 1]} : vector<16x128xi32> to vector<1x128xi32>
    %54 = vector.broadcast %10 : vector<128x1xi32> to vector<128x128xi32>
    %55 = vector.broadcast %53 : vector<1x128xi32> to vector<128x128xi32>
    %56 = arith.cmpi eq, %54, %55 : vector<128x128xi32>
    %57 = arith.extui %56 : vector<128x128xi1> to vector<128x128xi32>
    %58 = arith.sitofp %57 : vector<128x128xi32> to vector<128x128xf32>
    %59 = arith.truncf %58 : vector<128x128xf32> to vector<128x128xbf16>
    %c3 = arith.constant 3 : index
    %c0_24 = arith.constant 0 : index
    %c0_25 = arith.constant 0 : index
    %60 = vector.load %arg7[%c3, %c0_24, %c0_25] : memref<16x64x128xf32, #tpu.memory_space<vmem>>, vector<1x64x128xf32>
    %61 = vector.shape_cast %60 : vector<1x64x128xf32> to vector<64x128xf32>
    %cst_26 = arith.constant dense<0.000000e+00> : vector<64x128xf32>
    %62 = tpu.matmul %4, %59, %cst_26 {dimension_numbers = #tpu.dot_dimension_numbers<[1], [0], [0], [1], [0, 0, 1, 1], [], []>} : vector<64x128xbf16>, vector<128x128xbf16>, vector<64x128xf32> -> vector<64x128xf32>
    %63 = arith.addf %61, %62 : vector<64x128xf32>
    %c3_27 = arith.constant 3 : index
    %c0_28 = arith.constant 0 : index
    %c0_29 = arith.constant 0 : index
    %64 = vector.load %arg7[%c3_27, %c0_28, %c0_29] : memref<16x64x128xf32, #tpu.memory_space<vmem>>, vector<1x64x128xf32>
    %65 = vector.shape_cast %64 : vector<1x64x128xf32> to vector<64x128xf32>
    %66 = vector.shape_cast %63 : vector<64x128xf32> to vector<1x64x128xf32>
    tpu.vector_store %arg7[%c3_27, %c0_28, %c0_29], %66 {strides = array<i32>} : memref<16x64x128xf32, #tpu.memory_space<vmem>>, vector<1x64x128xf32>,
    %67 = vector.extract_strided_slice %6 {offsets = [4, 0], sizes = [1, 128], strides = [1, 1]} : vector<16x128xi32> to vector<1x128xi32>
    %68 = vector.broadcast %10 : vector<128x1xi32> to vector<128x128xi32>
    %69 = vector.broadcast %67 : vector<1x128xi32> to vector<128x128xi32>
    %70 = arith.cmpi eq, %68, %69 : vector<128x128xi32>
    %71 = arith.extui %70 : vector<128x128xi1> to vector<128x128xi32>
    %72 = arith.sitofp %71 : vector<128x128xi32> to vector<128x128xf32>
    %73 = arith.truncf %72 : vector<128x128xf32> to vector<128x128xbf16>
    %c4 = arith.constant 4 : index
    %c0_30 = arith.constant 0 : index
    %c0_31 = arith.constant 0 : index
    %74 = vector.load %arg7[%c4, %c0_30, %c0_31] : memref<16x64x128xf32, #tpu.memory_space<vmem>>, vector<1x64x128xf32>
    %75 = vector.shape_cast %74 : vector<1x64x128xf32> to vector<64x128xf32>
    %cst_32 = arith.constant dense<0.000000e+00> : vector<64x128xf32>
    %76 = tpu.matmul %4, %73, %cst_32 {dimension_numbers = #tpu.dot_dimension_numbers<[1], [0], [0], [1], [0, 0, 1, 1], [], []>} : vector<64x128xbf16>, vector<128x128xbf16>, vector<64x128xf32> -> vector<64x128xf32>
    %77 = arith.addf %75, %76 : vector<64x128xf32>
    %c4_33 = arith.constant 4 : index
    %c0_34 = arith.constant 0 : index
    %c0_35 = arith.constant 0 : index
    %78 = vector.load %arg7[%c4_33, %c0_34, %c0_35] : memref<16x64x128xf32, #tpu.memory_space<vmem>>, vector<1x64x128xf32>
    %79 = vector.shape_cast %78 : vector<1x64x128xf32> to vector<64x128xf32>
    %80 = vector.shape_cast %77 : vector<64x128xf32> to vector<1x64x128xf32>
    tpu.vector_store %arg7[%c4_33, %c0_34, %c0_35], %80 {strides = array<i32>} : memref<16x64x128xf32, #tpu.memory_space<vmem>>, vector<1x64x128xf32>,
    %81 = vector.extract_strided_slice %6 {offsets = [5, 0], sizes = [1, 128], strides = [1, 1]} : vector<16x128xi32> to vector<1x128xi32>
    %82 = vector.broadcast %10 : vector<128x1xi32> to vector<128x128xi32>
    %83 = vector.broadcast %81 : vector<1x128xi32> to vector<128x128xi32>
    %84 = arith.cmpi eq, %82, %83 : vector<128x128xi32>
    %85 = arith.extui %84 : vector<128x128xi1> to vector<128x128xi32>
    %86 = arith.sitofp %85 : vector<128x128xi32> to vector<128x128xf32>
    %87 = arith.truncf %86 : vector<128x128xf32> to vector<128x128xbf16>
    %c5 = arith.constant 5 : index
    %c0_36 = arith.constant 0 : index
    %c0_37 = arith.constant 0 : index
    %88 = vector.load %arg7[%c5, %c0_36, %c0_37] : memref<16x64x128xf32, #tpu.memory_space<vmem>>, vector<1x64x128xf32>
    %89 = vector.shape_cast %88 : vector<1x64x128xf32> to vector<64x128xf32>
    %cst_38 = arith.constant dense<0.000000e+00> : vector<64x128xf32>
    %90 = tpu.matmul %4, %87, %cst_38 {dimension_numbers = #tpu.dot_dimension_numbers<[1], [0], [0], [1], [0, 0, 1, 1], [], []>} : vector<64x128xbf16>, vector<128x128xbf16>, vector<64x128xf32> -> vector<64x128xf32>
    %91 = arith.addf %89, %90 : vector<64x128xf32>
    %c5_39 = arith.constant 5 : index
    %c0_40 = arith.constant 0 : index
    %c0_41 = arith.constant 0 : index
    %92 = vector.load %arg7[%c5_39, %c0_40, %c0_41] : memref<16x64x128xf32, #tpu.memory_space<vmem>>, vector<1x64x128xf32>
    %93 = vector.shape_cast %92 : vector<1x64x128xf32> to vector<64x128xf32>
    %94 = vector.shape_cast %91 : vector<64x128xf32> to vector<1x64x128xf32>
    tpu.vector_store %arg7[%c5_39, %c0_40, %c0_41], %94 {strides = array<i32>} : memref<16x64x128xf32, #tpu.memory_space<vmem>>, vector<1x64x128xf32>,
    %95 = vector.extract_strided_slice %6 {offsets = [6, 0], sizes = [1, 128], strides = [1, 1]} : vector<16x128xi32> to vector<1x128xi32>
    %96 = vector.broadcast %10 : vector<128x1xi32> to vector<128x128xi32>
    %97 = vector.broadcast %95 : vector<1x128xi32> to vector<128x128xi32>
    %98 = arith.cmpi eq, %96, %97 : vector<128x128xi32>
    %99 = arith.extui %98 : vector<128x128xi1> to vector<128x128xi32>
    %100 = arith.sitofp %99 : vector<128x128xi32> to vector<128x128xf32>
    %101 = arith.truncf %100 : vector<128x128xf32> to vector<128x128xbf16>
    %c6 = arith.constant 6 : index
    %c0_42 = arith.constant 0 : index
    %c0_43 = arith.constant 0 : index
    %102 = vector.load %arg7[%c6, %c0_42, %c0_43] : memref<16x64x128xf32, #tpu.memory_space<vmem>>, vector<1x64x128xf32>
    %103 = vector.shape_cast %102 : vector<1x64x128xf32> to vector<64x128xf32>
    %cst_44 = arith.constant dense<0.000000e+00> : vector<64x128xf32>
    %104 = tpu.matmul %4, %101, %cst_44 {dimension_numbers = #tpu.dot_dimension_numbers<[1], [0], [0], [1], [0, 0, 1, 1], [], []>} : vector<64x128xbf16>, vector<128x128xbf16>, vector<64x128xf32> -> vector<64x128xf32>
    %105 = arith.addf %103, %104 : vector<64x128xf32>
    %c6_45 = arith.constant 6 : index
    %c0_46 = arith.constant 0 : index
    %c0_47 = arith.constant 0 : index
    %106 = vector.load %arg7[%c6_45, %c0_46, %c0_47] : memref<16x64x128xf32, #tpu.memory_space<vmem>>, vector<1x64x128xf32>
    %107 = vector.shape_cast %106 : vector<1x64x128xf32> to vector<64x128xf32>
    %108 = vector.shape_cast %105 : vector<64x128xf32> to vector<1x64x128xf32>
    tpu.vector_store %arg7[%c6_45, %c0_46, %c0_47], %108 {strides = array<i32>} : memref<16x64x128xf32, #tpu.memory_space<vmem>>, vector<1x64x128xf32>,
    %109 = vector.extract_strided_slice %6 {offsets = [7, 0], sizes = [1, 128], strides = [1, 1]} : vector<16x128xi32> to vector<1x128xi32>
    %110 = vector.broadcast %10 : vector<128x1xi32> to vector<128x128xi32>
    %111 = vector.broadcast %109 : vector<1x128xi32> to vector<128x128xi32>
    %112 = arith.cmpi eq, %110, %111 : vector<128x128xi32>
    %113 = arith.extui %112 : vector<128x128xi1> to vector<128x128xi32>
    %114 = arith.sitofp %113 : vector<128x128xi32> to vector<128x128xf32>
    %115 = arith.truncf %114 : vector<128x128xf32> to vector<128x128xbf16>
    %c7 = arith.constant 7 : index
    %c0_48 = arith.constant 0 : index
    %c0_49 = arith.constant 0 : index
    %116 = vector.load %arg7[%c7, %c0_48, %c0_49] : memref<16x64x128xf32, #tpu.memory_space<vmem>>, vector<1x64x128xf32>
    %117 = vector.shape_cast %116 : vector<1x64x128xf32> to vector<64x128xf32>
    %cst_50 = arith.constant dense<0.000000e+00> : vector<64x128xf32>
    %118 = tpu.matmul %4, %115, %cst_50 {dimension_numbers = #tpu.dot_dimension_numbers<[1], [0], [0], [1], [0, 0, 1, 1], [], []>} : vector<64x128xbf16>, vector<128x128xbf16>, vector<64x128xf32> -> vector<64x128xf32>
    %119 = arith.addf %117, %118 : vector<64x128xf32>
    %c7_51 = arith.constant 7 : index
    %c0_52 = arith.constant 0 : index
    %c0_53 = arith.constant 0 : index
    %120 = vector.load %arg7[%c7_51, %c0_52, %c0_53] : memref<16x64x128xf32, #tpu.memory_space<vmem>>, vector<1x64x128xf32>
    %121 = vector.shape_cast %120 : vector<1x64x128xf32> to vector<64x128xf32>
    %122 = vector.shape_cast %119 : vector<64x128xf32> to vector<1x64x128xf32>
    tpu.vector_store %arg7[%c7_51, %c0_52, %c0_53], %122 {strides = array<i32>} : memref<16x64x128xf32, #tpu.memory_space<vmem>>, vector<1x64x128xf32>,
    %123 = vector.extract_strided_slice %6 {offsets = [8, 0], sizes = [1, 128], strides = [1, 1]} : vector<16x128xi32> to vector<1x128xi32>
    %124 = vector.broadcast %10 : vector<128x1xi32> to vector<128x128xi32>
    %125 = vector.broadcast %123 : vector<1x128xi32> to vector<128x128xi32>
    %126 = arith.cmpi eq, %124, %125 : vector<128x128xi32>
    %127 = arith.extui %126 : vector<128x128xi1> to vector<128x128xi32>
    %128 = arith.sitofp %127 : vector<128x128xi32> to vector<128x128xf32>
    %129 = arith.truncf %128 : vector<128x128xf32> to vector<128x128xbf16>
    %c8 = arith.constant 8 : index
    %c0_54 = arith.constant 0 : index
    %c0_55 = arith.constant 0 : index
    %130 = vector.load %arg7[%c8, %c0_54, %c0_55] : memref<16x64x128xf32, #tpu.memory_space<vmem>>, vector<1x64x128xf32>
    %131 = vector.shape_cast %130 : vector<1x64x128xf32> to vector<64x128xf32>
    %cst_56 = arith.constant dense<0.000000e+00> : vector<64x128xf32>
    %132 = tpu.matmul %4, %129, %cst_56 {dimension_numbers = #tpu.dot_dimension_numbers<[1], [0], [0], [1], [0, 0, 1, 1], [], []>} : vector<64x128xbf16>, vector<128x128xbf16>, vector<64x128xf32> -> vector<64x128xf32>
    %133 = arith.addf %131, %132 : vector<64x128xf32>
    %c8_57 = arith.constant 8 : index
    %c0_58 = arith.constant 0 : index
    %c0_59 = arith.constant 0 : index
    %134 = vector.load %arg7[%c8_57, %c0_58, %c0_59] : memref<16x64x128xf32, #tpu.memory_space<vmem>>, vector<1x64x128xf32>
    %135 = vector.shape_cast %134 : vector<1x64x128xf32> to vector<64x128xf32>
    %136 = vector.shape_cast %133 : vector<64x128xf32> to vector<1x64x128xf32>
    tpu.vector_store %arg7[%c8_57, %c0_58, %c0_59], %136 {strides = array<i32>} : memref<16x64x128xf32, #tpu.memory_space<vmem>>, vector<1x64x128xf32>,
    %137 = vector.extract_strided_slice %6 {offsets = [9, 0], sizes = [1, 128], strides = [1, 1]} : vector<16x128xi32> to vector<1x128xi32>
    %138 = vector.broadcast %10 : vector<128x1xi32> to vector<128x128xi32>
    %139 = vector.broadcast %137 : vector<1x128xi32> to vector<128x128xi32>
    %140 = arith.cmpi eq, %138, %139 : vector<128x128xi32>
    %141 = arith.extui %140 : vector<128x128xi1> to vector<128x128xi32>
    %142 = arith.sitofp %141 : vector<128x128xi32> to vector<128x128xf32>
    %143 = arith.truncf %142 : vector<128x128xf32> to vector<128x128xbf16>
    %c9 = arith.constant 9 : index
    %c0_60 = arith.constant 0 : index
    %c0_61 = arith.constant 0 : index
    %144 = vector.load %arg7[%c9, %c0_60, %c0_61] : memref<16x64x128xf32, #tpu.memory_space<vmem>>, vector<1x64x128xf32>
    %145 = vector.shape_cast %144 : vector<1x64x128xf32> to vector<64x128xf32>
    %cst_62 = arith.constant dense<0.000000e+00> : vector<64x128xf32>
    %146 = tpu.matmul %4, %143, %cst_62 {dimension_numbers = #tpu.dot_dimension_numbers<[1], [0], [0], [1], [0, 0, 1, 1], [], []>} : vector<64x128xbf16>, vector<128x128xbf16>, vector<64x128xf32> -> vector<64x128xf32>
    %147 = arith.addf %145, %146 : vector<64x128xf32>
    %c9_63 = arith.constant 9 : index
    %c0_64 = arith.constant 0 : index
    %c0_65 = arith.constant 0 : index
    %148 = vector.load %arg7[%c9_63, %c0_64, %c0_65] : memref<16x64x128xf32, #tpu.memory_space<vmem>>, vector<1x64x128xf32>
    %149 = vector.shape_cast %148 : vector<1x64x128xf32> to vector<64x128xf32>
    %150 = vector.shape_cast %147 : vector<64x128xf32> to vector<1x64x128xf32>
    tpu.vector_store %arg7[%c9_63, %c0_64, %c0_65], %150 {strides = array<i32>} : memref<16x64x128xf32, #tpu.memory_space<vmem>>, vector<1x64x128xf32>,
    %151 = vector.extract_strided_slice %6 {offsets = [10, 0], sizes = [1, 128], strides = [1, 1]} : vector<16x128xi32> to vector<1x128xi32>
    %152 = vector.broadcast %10 : vector<128x1xi32> to vector<128x128xi32>
    %153 = vector.broadcast %151 : vector<1x128xi32> to vector<128x128xi32>
    %154 = arith.cmpi eq, %152, %153 : vector<128x128xi32>
    %155 = arith.extui %154 : vector<128x128xi1> to vector<128x128xi32>
    %156 = arith.sitofp %155 : vector<128x128xi32> to vector<128x128xf32>
    %157 = arith.truncf %156 : vector<128x128xf32> to vector<128x128xbf16>
    %c10 = arith.constant 10 : index
    %c0_66 = arith.constant 0 : index
    %c0_67 = arith.constant 0 : index
    %158 = vector.load %arg7[%c10, %c0_66, %c0_67] : memref<16x64x128xf32, #tpu.memory_space<vmem>>, vector<1x64x128xf32>
    %159 = vector.shape_cast %158 : vector<1x64x128xf32> to vector<64x128xf32>
    %cst_68 = arith.constant dense<0.000000e+00> : vector<64x128xf32>
    %160 = tpu.matmul %4, %157, %cst_68 {dimension_numbers = #tpu.dot_dimension_numbers<[1], [0], [0], [1], [0, 0, 1, 1], [], []>} : vector<64x128xbf16>, vector<128x128xbf16>, vector<64x128xf32> -> vector<64x128xf32>
    %161 = arith.addf %159, %160 : vector<64x128xf32>
    %c10_69 = arith.constant 10 : index
    %c0_70 = arith.constant 0 : index
    %c0_71 = arith.constant 0 : index
    %162 = vector.load %arg7[%c10_69, %c0_70, %c0_71] : memref<16x64x128xf32, #tpu.memory_space<vmem>>, vector<1x64x128xf32>
    %163 = vector.shape_cast %162 : vector<1x64x128xf32> to vector<64x128xf32>
    %164 = vector.shape_cast %161 : vector<64x128xf32> to vector<1x64x128xf32>
    tpu.vector_store %arg7[%c10_69, %c0_70, %c0_71], %164 {strides = array<i32>} : memref<16x64x128xf32, #tpu.memory_space<vmem>>, vector<1x64x128xf32>,
    %165 = vector.extract_strided_slice %6 {offsets = [11, 0], sizes = [1, 128], strides = [1, 1]} : vector<16x128xi32> to vector<1x128xi32>
    %166 = vector.broadcast %10 : vector<128x1xi32> to vector<128x128xi32>
    %167 = vector.broadcast %165 : vector<1x128xi32> to vector<128x128xi32>
    %168 = arith.cmpi eq, %166, %167 : vector<128x128xi32>
    %169 = arith.extui %168 : vector<128x128xi1> to vector<128x128xi32>
    %170 = arith.sitofp %169 : vector<128x128xi32> to vector<128x128xf32>
    %171 = arith.truncf %170 : vector<128x128xf32> to vector<128x128xbf16>
    %c11 = arith.constant 11 : index
    %c0_72 = arith.constant 0 : index
    %c0_73 = arith.constant 0 : index
    %172 = vector.load %arg7[%c11, %c0_72, %c0_73] : memref<16x64x128xf32, #tpu.memory_space<vmem>>, vector<1x64x128xf32>
    %173 = vector.shape_cast %172 : vector<1x64x128xf32> to vector<64x128xf32>
    %cst_74 = arith.constant dense<0.000000e+00> : vector<64x128xf32>
    %174 = tpu.matmul %4, %171, %cst_74 {dimension_numbers = #tpu.dot_dimension_numbers<[1], [0], [0], [1], [0, 0, 1, 1], [], []>} : vector<64x128xbf16>, vector<128x128xbf16>, vector<64x128xf32> -> vector<64x128xf32>
    %175 = arith.addf %173, %174 : vector<64x128xf32>
    %c11_75 = arith.constant 11 : index
    %c0_76 = arith.constant 0 : index
    %c0_77 = arith.constant 0 : index
    %176 = vector.load %arg7[%c11_75, %c0_76, %c0_77] : memref<16x64x128xf32, #tpu.memory_space<vmem>>, vector<1x64x128xf32>
    %177 = vector.shape_cast %176 : vector<1x64x128xf32> to vector<64x128xf32>
    %178 = vector.shape_cast %175 : vector<64x128xf32> to vector<1x64x128xf32>
    tpu.vector_store %arg7[%c11_75, %c0_76, %c0_77], %178 {strides = array<i32>} : memref<16x64x128xf32, #tpu.memory_space<vmem>>, vector<1x64x128xf32>,
    %179 = vector.extract_strided_slice %6 {offsets = [12, 0], sizes = [1, 128], strides = [1, 1]} : vector<16x128xi32> to vector<1x128xi32>
    %180 = vector.broadcast %10 : vector<128x1xi32> to vector<128x128xi32>
    %181 = vector.broadcast %179 : vector<1x128xi32> to vector<128x128xi32>
    %182 = arith.cmpi eq, %180, %181 : vector<128x128xi32>
    %183 = arith.extui %182 : vector<128x128xi1> to vector<128x128xi32>
    %184 = arith.sitofp %183 : vector<128x128xi32> to vector<128x128xf32>
    %185 = arith.truncf %184 : vector<128x128xf32> to vector<128x128xbf16>
    %c12 = arith.constant 12 : index
    %c0_78 = arith.constant 0 : index
    %c0_79 = arith.constant 0 : index
    %186 = vector.load %arg7[%c12, %c0_78, %c0_79] : memref<16x64x128xf32, #tpu.memory_space<vmem>>, vector<1x64x128xf32>
    %187 = vector.shape_cast %186 : vector<1x64x128xf32> to vector<64x128xf32>
    %cst_80 = arith.constant dense<0.000000e+00> : vector<64x128xf32>
    %188 = tpu.matmul %4, %185, %cst_80 {dimension_numbers = #tpu.dot_dimension_numbers<[1], [0], [0], [1], [0, 0, 1, 1], [], []>} : vector<64x128xbf16>, vector<128x128xbf16>, vector<64x128xf32> -> vector<64x128xf32>
    %189 = arith.addf %187, %188 : vector<64x128xf32>
    %c12_81 = arith.constant 12 : index
    %c0_82 = arith.constant 0 : index
    %c0_83 = arith.constant 0 : index
    %190 = vector.load %arg7[%c12_81, %c0_82, %c0_83] : memref<16x64x128xf32, #tpu.memory_space<vmem>>, vector<1x64x128xf32>
    %191 = vector.shape_cast %190 : vector<1x64x128xf32> to vector<64x128xf32>
    %192 = vector.shape_cast %189 : vector<64x128xf32> to vector<1x64x128xf32>
    tpu.vector_store %arg7[%c12_81, %c0_82, %c0_83], %192 {strides = array<i32>} : memref<16x64x128xf32, #tpu.memory_space<vmem>>, vector<1x64x128xf32>,
    %193 = vector.extract_strided_slice %6 {offsets = [13, 0], sizes = [1, 128], strides = [1, 1]} : vector<16x128xi32> to vector<1x128xi32>
    %194 = vector.broadcast %10 : vector<128x1xi32> to vector<128x128xi32>
    %195 = vector.broadcast %193 : vector<1x128xi32> to vector<128x128xi32>
    %196 = arith.cmpi eq, %194, %195 : vector<128x128xi32>
    %197 = arith.extui %196 : vector<128x128xi1> to vector<128x128xi32>
    %198 = arith.sitofp %197 : vector<128x128xi32> to vector<128x128xf32>
    %199 = arith.truncf %198 : vector<128x128xf32> to vector<128x128xbf16>
    %c13 = arith.constant 13 : index
    %c0_84 = arith.constant 0 : index
    %c0_85 = arith.constant 0 : index
    %200 = vector.load %arg7[%c13, %c0_84, %c0_85] : memref<16x64x128xf32, #tpu.memory_space<vmem>>, vector<1x64x128xf32>
    %201 = vector.shape_cast %200 : vector<1x64x128xf32> to vector<64x128xf32>
    %cst_86 = arith.constant dense<0.000000e+00> : vector<64x128xf32>
    %202 = tpu.matmul %4, %199, %cst_86 {dimension_numbers = #tpu.dot_dimension_numbers<[1], [0], [0], [1], [0, 0, 1, 1], [], []>} : vector<64x128xbf16>, vector<128x128xbf16>, vector<64x128xf32> -> vector<64x128xf32>
    %203 = arith.addf %201, %202 : vector<64x128xf32>
    %c13_87 = arith.constant 13 : index
    %c0_88 = arith.constant 0 : index
    %c0_89 = arith.constant 0 : index
    %204 = vector.load %arg7[%c13_87, %c0_88, %c0_89] : memref<16x64x128xf32, #tpu.memory_space<vmem>>, vector<1x64x128xf32>
    %205 = vector.shape_cast %204 : vector<1x64x128xf32> to vector<64x128xf32>
    %206 = vector.shape_cast %203 : vector<64x128xf32> to vector<1x64x128xf32>
    tpu.vector_store %arg7[%c13_87, %c0_88, %c0_89], %206 {strides = array<i32>} : memref<16x64x128xf32, #tpu.memory_space<vmem>>, vector<1x64x128xf32>,
    %207 = vector.extract_strided_slice %6 {offsets = [14, 0], sizes = [1, 128], strides = [1, 1]} : vector<16x128xi32> to vector<1x128xi32>
    %208 = vector.broadcast %10 : vector<128x1xi32> to vector<128x128xi32>
    %209 = vector.broadcast %207 : vector<1x128xi32> to vector<128x128xi32>
    %210 = arith.cmpi eq, %208, %209 : vector<128x128xi32>
    %211 = arith.extui %210 : vector<128x128xi1> to vector<128x128xi32>
    %212 = arith.sitofp %211 : vector<128x128xi32> to vector<128x128xf32>
    %213 = arith.truncf %212 : vector<128x128xf32> to vector<128x128xbf16>
    %c14 = arith.constant 14 : index
    %c0_90 = arith.constant 0 : index
    %c0_91 = arith.constant 0 : index
    %214 = vector.load %arg7[%c14, %c0_90, %c0_91] : memref<16x64x128xf32, #tpu.memory_space<vmem>>, vector<1x64x128xf32>
    %215 = vector.shape_cast %214 : vector<1x64x128xf32> to vector<64x128xf32>
    %cst_92 = arith.constant dense<0.000000e+00> : vector<64x128xf32>
    %216 = tpu.matmul %4, %213, %cst_92 {dimension_numbers = #tpu.dot_dimension_numbers<[1], [0], [0], [1], [0, 0, 1, 1], [], []>} : vector<64x128xbf16>, vector<128x128xbf16>, vector<64x128xf32> -> vector<64x128xf32>
    %217 = arith.addf %215, %216 : vector<64x128xf32>
    %c14_93 = arith.constant 14 : index
    %c0_94 = arith.constant 0 : index
    %c0_95 = arith.constant 0 : index
    %218 = vector.load %arg7[%c14_93, %c0_94, %c0_95] : memref<16x64x128xf32, #tpu.memory_space<vmem>>, vector<1x64x128xf32>
    %219 = vector.shape_cast %218 : vector<1x64x128xf32> to vector<64x128xf32>
    %220 = vector.shape_cast %217 : vector<64x128xf32> to vector<1x64x128xf32>
    tpu.vector_store %arg7[%c14_93, %c0_94, %c0_95], %220 {strides = array<i32>} : memref<16x64x128xf32, #tpu.memory_space<vmem>>, vector<1x64x128xf32>,
    %221 = vector.extract_strided_slice %6 {offsets = [15, 0], sizes = [1, 128], strides = [1, 1]} : vector<16x128xi32> to vector<1x128xi32>
    %222 = vector.broadcast %10 : vector<128x1xi32> to vector<128x128xi32>
    %223 = vector.broadcast %221 : vector<1x128xi32> to vector<128x128xi32>
    %224 = arith.cmpi eq, %222, %223 : vector<128x128xi32>
    %225 = arith.extui %224 : vector<128x128xi1> to vector<128x128xi32>
    %226 = arith.sitofp %225 : vector<128x128xi32> to vector<128x128xf32>
    %227 = arith.truncf %226 : vector<128x128xf32> to vector<128x128xbf16>
    %c15 = arith.constant 15 : index
    %c0_96 = arith.constant 0 : index
    %c0_97 = arith.constant 0 : index
    %228 = vector.load %arg7[%c15, %c0_96, %c0_97] : memref<16x64x128xf32, #tpu.memory_space<vmem>>, vector<1x64x128xf32>
    %229 = vector.shape_cast %228 : vector<1x64x128xf32> to vector<64x128xf32>
    %cst_98 = arith.constant dense<0.000000e+00> : vector<64x128xf32>
    %230 = tpu.matmul %4, %227, %cst_98 {dimension_numbers = #tpu.dot_dimension_numbers<[1], [0], [0], [1], [0, 0, 1, 1], [], []>} : vector<64x128xbf16>, vector<128x128xbf16>, vector<64x128xf32> -> vector<64x128xf32>
    %231 = arith.addf %229, %230 : vector<64x128xf32>
    %c15_99 = arith.constant 15 : index
    %c0_100 = arith.constant 0 : index
    %c0_101 = arith.constant 0 : index
    %232 = vector.load %arg7[%c15_99, %c0_100, %c0_101] : memref<16x64x128xf32, #tpu.memory_space<vmem>>, vector<1x64x128xf32>
    %233 = vector.shape_cast %232 : vector<1x64x128xf32> to vector<64x128xf32>
    %234 = vector.shape_cast %231 : vector<64x128xf32> to vector<1x64x128xf32>
    tpu.vector_store %arg7[%c15_99, %c0_100, %c0_101], %234 {strides = array<i32>} : memref<16x64x128xf32, #tpu.memory_space<vmem>>, vector<1x64x128xf32>,
    %c0_i32_102 = arith.constant 0 : i32
    %235 = arith.cmpi eq, %arg2, %c0_i32_102 : i32
    %236 = arith.extui %235 : i1 to i32
    %c0_i32_103 = arith.constant 0 : i32
    %237 = arith.cmpi ne, %236, %c0_i32_103 : i32
    scf.if %237 {
      %c0_104 = arith.constant 0 : index
      %c0_105 = arith.constant 0 : index
      %c0_106 = arith.constant 0 : index
      %238 = vector.load %arg7[%c0_104, %c0_105, %c0_106] : memref<16x64x128xf32, #tpu.memory_space<vmem>>, vector<1x64x128xf32>
      %239 = vector.shape_cast %238 : vector<1x64x128xf32> to vector<64x128xf32>
      %c1_107 = arith.constant 1 : index
      %c0_108 = arith.constant 0 : index
      %c0_109 = arith.constant 0 : index
      %240 = vector.load %arg7[%c1_107, %c0_108, %c0_109] : memref<16x64x128xf32, #tpu.memory_space<vmem>>, vector<1x64x128xf32>
      %241 = vector.shape_cast %240 : vector<1x64x128xf32> to vector<64x128xf32>
      %242 = arith.maximumf %239, %241 : vector<64x128xf32>
      %c2_110 = arith.constant 2 : index
      %c0_111 = arith.constant 0 : index
      %c0_112 = arith.constant 0 : index
      %243 = vector.load %arg7[%c2_110, %c0_111, %c0_112] : memref<16x64x128xf32, #tpu.memory_space<vmem>>, vector<1x64x128xf32>
      %244 = vector.shape_cast %243 : vector<1x64x128xf32> to vector<64x128xf32>
      %245 = arith.maximumf %242, %244 : vector<64x128xf32>
      %c3_113 = arith.constant 3 : index
      %c0_114 = arith.constant 0 : index
      %c0_115 = arith.constant 0 : index
      %246 = vector.load %arg7[%c3_113, %c0_114, %c0_115] : memref<16x64x128xf32, #tpu.memory_space<vmem>>, vector<1x64x128xf32>
      %247 = vector.shape_cast %246 : vector<1x64x128xf32> to vector<64x128xf32>
      %248 = arith.maximumf %245, %247 : vector<64x128xf32>
      %c4_116 = arith.constant 4 : index
      %c0_117 = arith.constant 0 : index
      %c0_118 = arith.constant 0 : index
      %249 = vector.load %arg7[%c4_116, %c0_117, %c0_118] : memref<16x64x128xf32, #tpu.memory_space<vmem>>, vector<1x64x128xf32>
      %250 = vector.shape_cast %249 : vector<1x64x128xf32> to vector<64x128xf32>
      %251 = arith.maximumf %248, %250 : vector<64x128xf32>
      %c5_119 = arith.constant 5 : index
      %c0_120 = arith.constant 0 : index
      %c0_121 = arith.constant 0 : index
      %252 = vector.load %arg7[%c5_119, %c0_120, %c0_121] : memref<16x64x128xf32, #tpu.memory_space<vmem>>, vector<1x64x128xf32>
      %253 = vector.shape_cast %252 : vector<1x64x128xf32> to vector<64x128xf32>
      %254 = arith.maximumf %251, %253 : vector<64x128xf32>
      %c6_122 = arith.constant 6 : index
      %c0_123 = arith.constant 0 : index
      %c0_124 = arith.constant 0 : index
      %255 = vector.load %arg7[%c6_122, %c0_123, %c0_124] : memref<16x64x128xf32, #tpu.memory_space<vmem>>, vector<1x64x128xf32>
      %256 = vector.shape_cast %255 : vector<1x64x128xf32> to vector<64x128xf32>
      %257 = arith.maximumf %254, %256 : vector<64x128xf32>
      %c7_125 = arith.constant 7 : index
      %c0_126 = arith.constant 0 : index
      %c0_127 = arith.constant 0 : index
      %258 = vector.load %arg7[%c7_125, %c0_126, %c0_127] : memref<16x64x128xf32, #tpu.memory_space<vmem>>, vector<1x64x128xf32>
      %259 = vector.shape_cast %258 : vector<1x64x128xf32> to vector<64x128xf32>
      %260 = arith.maximumf %257, %259 : vector<64x128xf32>
      %c8_128 = arith.constant 8 : index
      %c0_129 = arith.constant 0 : index
      %c0_130 = arith.constant 0 : index
      %261 = vector.load %arg7[%c8_128, %c0_129, %c0_130] : memref<16x64x128xf32, #tpu.memory_space<vmem>>, vector<1x64x128xf32>
      %262 = vector.shape_cast %261 : vector<1x64x128xf32> to vector<64x128xf32>
      %263 = arith.maximumf %260, %262 : vector<64x128xf32>
      %c9_131 = arith.constant 9 : index
      %c0_132 = arith.constant 0 : index
      %c0_133 = arith.constant 0 : index
      %264 = vector.load %arg7[%c9_131, %c0_132, %c0_133] : memref<16x64x128xf32, #tpu.memory_space<vmem>>, vector<1x64x128xf32>
      %265 = vector.shape_cast %264 : vector<1x64x128xf32> to vector<64x128xf32>
      %266 = arith.maximumf %263, %265 : vector<64x128xf32>
      %c10_134 = arith.constant 10 : index
      %c0_135 = arith.constant 0 : index
      %c0_136 = arith.constant 0 : index
      %267 = vector.load %arg7[%c10_134, %c0_135, %c0_136] : memref<16x64x128xf32, #tpu.memory_space<vmem>>, vector<1x64x128xf32>
      %268 = vector.shape_cast %267 : vector<1x64x128xf32> to vector<64x128xf32>
      %269 = arith.maximumf %266, %268 : vector<64x128xf32>
      %c11_137 = arith.constant 11 : index
      %c0_138 = arith.constant 0 : index
      %c0_139 = arith.constant 0 : index
      %270 = vector.load %arg7[%c11_137, %c0_138, %c0_139] : memref<16x64x128xf32, #tpu.memory_space<vmem>>, vector<1x64x128xf32>
      %271 = vector.shape_cast %270 : vector<1x64x128xf32> to vector<64x128xf32>
      %272 = arith.maximumf %269, %271 : vector<64x128xf32>
      %c12_140 = arith.constant 12 : index
      %c0_141 = arith.constant 0 : index
      %c0_142 = arith.constant 0 : index
      %273 = vector.load %arg7[%c12_140, %c0_141, %c0_142] : memref<16x64x128xf32, #tpu.memory_space<vmem>>, vector<1x64x128xf32>
      %274 = vector.shape_cast %273 : vector<1x64x128xf32> to vector<64x128xf32>
      %275 = arith.maximumf %272, %274 : vector<64x128xf32>
      %c13_143 = arith.constant 13 : index
      %c0_144 = arith.constant 0 : index
      %c0_145 = arith.constant 0 : index
      %276 = vector.load %arg7[%c13_143, %c0_144, %c0_145] : memref<16x64x128xf32, #tpu.memory_space<vmem>>, vector<1x64x128xf32>
      %277 = vector.shape_cast %276 : vector<1x64x128xf32> to vector<64x128xf32>
      %278 = arith.maximumf %275, %277 : vector<64x128xf32>
      %c14_146 = arith.constant 14 : index
      %c0_147 = arith.constant 0 : index
      %c0_148 = arith.constant 0 : index
      %279 = vector.load %arg7[%c14_146, %c0_147, %c0_148] : memref<16x64x128xf32, #tpu.memory_space<vmem>>, vector<1x64x128xf32>
      %280 = vector.shape_cast %279 : vector<1x64x128xf32> to vector<64x128xf32>
      %281 = arith.maximumf %278, %280 : vector<64x128xf32>
      %c15_149 = arith.constant 15 : index
      %c0_150 = arith.constant 0 : index
      %c0_151 = arith.constant 0 : index
      %282 = vector.load %arg7[%c15_149, %c0_150, %c0_151] : memref<16x64x128xf32, #tpu.memory_space<vmem>>, vector<1x64x128xf32>
      %283 = vector.shape_cast %282 : vector<1x64x128xf32> to vector<64x128xf32>
      %284 = arith.maximumf %281, %283 : vector<64x128xf32>
      %c0_152 = arith.constant 0 : index
      %c0_153 = arith.constant 0 : index
      %c0_154 = arith.constant 0 : index
      %285 = vector.load %arg5[%c0_152, %c0_153, %c0_154] : memref<1x64x128xbf16, #tpu.memory_space<vmem>>, vector<1x64x128xbf16>
      %286 = vector.shape_cast %285 : vector<1x64x128xbf16> to vector<64x128xbf16>
      %287 = arith.extf %286 : vector<64x128xbf16> to vector<64x128xf32>
      %288 = arith.maximumf %284, %287 : vector<64x128xf32>
      %c0_155 = arith.constant 0 : index
      %c0_156 = arith.constant 0 : index
      %c0_157 = arith.constant 0 : index
      %289 = vector.load %arg6[%c0_155, %c0_156, %c0_157] : memref<1x64x128xf32, #tpu.memory_space<vmem>>, vector<1x64x128xf32>
      %290 = vector.shape_cast %289 : vector<1x64x128xf32> to vector<64x128xf32>
      %291 = vector.shape_cast %288 : vector<64x128xf32> to vector<1x64x128xf32>
      tpu.vector_store %arg6[%c0_155, %c0_156, %c0_157], %291 {strides = array<i32>} : memref<1x64x128xf32, #tpu.memory_space<vmem>>, vector<1x64x128xf32>,
    } else {
    }
    return
  }
  func.func @transform_0(%arg0: i32, %arg1: i32, %arg2: i32) -> (i32, i32, i32) {
    %c0_i32 = arith.constant 0 : i32
    %c0_i32_0 = arith.constant 0 : i32
    return %arg0, %c0_i32, %arg1 : i32, i32, i32
  }
  func.func @transform_1(%arg0: i32, %arg1: i32, %arg2: i32) -> (i32, i32, i32) {
    %c0_i32 = arith.constant 0 : i32
    %c0_i32_0 = arith.constant 0 : i32
    return %arg0, %c0_i32, %arg2 : i32, i32, i32
  }
  func.func @transform_2(%arg0: i32, %arg1: i32, %arg2: i32) -> (i32, i32, i32) {
    %c0_i32 = arith.constant 0 : i32
    %c0_i32_0 = arith.constant 0 : i32
    return %arg0, %c0_i32, %arg1 : i32, i32, i32
  }
  func.func @transform_3(%arg0: i32, %arg1: i32, %arg2: i32) -> (i32, i32, i32) {
    %c0_i32 = arith.constant 0 : i32
    %c0_i32_0 = arith.constant 0 : i32
    return %arg0, %c0_i32, %arg1 : i32, i32, i32
  }
}

</mosaic_0001>

<bundles_post_ra>
// kernel: tpu_custom_call.1
= control target key start
LH: loop header
LB: loop body
LE: loop exit
PB: predicated region body
PF: predicated region fallthrough
CT: control target
= control target key end

     0   :  { %s7231_s0 = inlined_call_operand.hbm [shape: s32[2,16,128], index: 0, kind: input, shape index: {}]   ;;  %s7232_s1 = inlined_call_operand.hbm [shape: bf16[2,64,128], index: 1, kind: input, shape index: {}]   ;;  %s7233_s2 = inlined_call_operand.hbm [shape: bf16[2,64,128], index: 2, kind: input, shape index: {}]   ;;  %s7234_s3 = inlined_call_operand.hbm [shape: f32[2,64,128], index: 3, kind: output, shape index: {}]  }
   0x1   :  { %7238 = sst [smem:[#allocation40_spill]] %s7232_s1 }
   0x2   :  { %7239 = sst [smem:[#allocation41_spill]] %s7233_s2 }
   0x3   :  { %8 = vsyncpa [#allocation4], 0 }
   0x4   :  { %10 = vsyncpa [#allocation4 + $0x1], 0 }
   0x5   :  { %11 = vsyncpa [#allocation7], 0 }
   0x6   :  { %13 = vsyncpa [#allocation7 + $0x1], 0 }
   0x7   :  { %14 = vsyncpa [#allocation5], 0 }
   0x8   :  { %16 = vsyncpa [#allocation5 + $0x1], 0  ;;  %s4756_s12 = smov 0   ;;  %s4758_s13 = smov 0  }
   0x9   :  { %s4760_s14 = smov 0   ;;  %s4762_s15 = smov 0  }
   0xa   :  { %s4764_s16 = smov 0   ;;  %s4766_s17 = smov 0  }
   0xb LB: > { %s4787_s18 = sadd.s32 4294967295, %s4723_s17   ;;  %s3331_s19 = sadd.s32 4294967294, %s4723_s17   ;;  %s4723_s17 = sphi %s4766_s17, %s22_s17   ;;  %s4719_s16 = sphi %s4764_s16, %s7537_s16   ;;  %s4715_s15 = sphi %s4762_s15, %s7536_s15   ;;  %s4711_s14 = sphi %s4760_s14, %s7535_s14   ;;  %s4707_s13 = sphi %s4758_s13, %s7534_s13   ;;  %s4703_s12 = sphi %s4756_s12, %s7533_s12  }
   0xc   : > { %s41_s20 = sadd.s32 1, %s4719_s16  ;;  %s50_s21 = sadd.s32 1, %s4711_s14 }
   0xd   : > { %p43_p0 = scmp.ge.s32.totalorder %s41_s20, 2  ;;  %p57_p1 = scmp.ne.s32.totalorder %s4711_s14, %s4707_s13 }
   0xe   : > { %p58_p2 = scmp.eq.s32.totalorder %s4723_s17, 0  ;;  %p63_p3 = scmp.ne.s32.totalorder %s4707_s13, %s4703_s12 }
   0xf   : > { %s7539_s20 = smov (%p43_p0, %s41_s20), 0  ;;  %p64_p5 = scmp.eq.s32.totalorder %s4787_s18, 0 }
  0x10   : > { %7240 = sst [smem:[#allocation13_spill]] %s7539_s20  ;;  %p4799_p4 = por %p58_p2, %p57_p1 }
  0x11   : > { %s45_s23 = ssub.s32 %s4719_s16, %s7539_s20  ;;  %p145_p6 = scmp.eq.s32.totalorder %s4787_s18, 1 }
  0x12   : > { %p48_p7 = scmp.eq.s32.totalorder %s45_s23, 0  ;;  %p4807_p8 = por %p64_p5, %p63_p3 }
  0x13   : > { %p4811_p9 = por %p145_p6, %p57_p1  ;;  %p151_p10 = scmp.eq.s32.totalorder %s3331_s19, 1 }
  0x14   : > { %s4816_s26 = scalar_select %p48_p7, %s4711_s14, %s50_s21  }
  0x15   : > { %p4818_p11 = por %p151_p10, %p63_p3  ;;  %p4490_p13 = scmp.lt.s32.totalorder %s4723_s17, 2 }
  0x16   : > { %s4825_s28 = sand.u32 1, %s4711_s14   ;;  %s193_s29 = sand.u32 1, %s4723_s17  }
  0x17   : > { %s3337_s30 = sshll.u32 %s4825_s28, 5  ;;  %p4831_p0 = pnand %p4490_p13, %p4799_p4 }
  0x18   : > { %s3870_s5 = sshll.u32 %s4719_s16, 9  ;;  %s7246_s1 = sld [smem:[#allocation40_spill]] }
  0x19   : > { %s197_s9 = scalar_lea.vmem [#allocation6], %s3337_s30  ;;  %s4841_s11 = scalar_lea.sflag [#allocation7], %s193_s29 }
  0x1a   : > { %s205_s10 = sshll.u32 %s197_s9, 4  ;;  %p4557_p1 = pneg %p4831_p0  ;;  %s206_s10 = int_to_ptr.vmem [resolvable:$true] %s205_s10 }
  0x1b   : > { %s4568_s19 = scalar_lea.vmem %s206_s10, 512  ;;  %s4725_s21 = smov [#allocation6]  }
  0x1c   : > { %p4569_p2 = scmp.ne.s32.totalorder %s206_s10, %s4568_s19  ;;  %s4573_s22 = sshll.u32 %s4725_s21, 4  ;;  %s4574_s22 = int_to_ptr.vmem [resolvable:$false] %s4573_s22 }
  0x1d   : > { %s4575_s23 = scalar_lea.vmem %s4574_s22, 1024  ;;  %p4576_p5 = scmp.lt.s32.totalorder %s206_s10, %s4574_s22 }
  0x1e   : > { %s204_s8 = scalar_lea.hbm %s7246_s1, %s3870_s5  ;;  %p4571_p3 = pnand %p4569_p2, %p4557_p1 }
  0x1f   : > { %p4577_p6 = scmp.lt.s32.totalorder %s4575_s23, %s4568_s19 }
  0x20   : > { %p4572_p4 = pneg %p4571_p3 }
  0x21   : > { %p4578_p7 = por %p4577_p6, %p4576_p5 }
  0x23   : > { %p4579_p10 = pnand %p4578_p7, %p4572_p4 }
  0x25   : > { %4582 = shalt.err (!%p4579_p10)
}
  0x26   : > { %s7236_s6 = smov 64   ;;  %s7237_s29 = smov 4  }
  0x27   : > { %4482 = dma.hbm_to_vmem [thread:$0]  (!%p4831_p0), %s204_s8, 512, %s206_s10, %s4841_s11, %s7236_s6, %s7236_s6, %s7237_s29  }
  0x28   : > { %s7247_s2 = sld [smem:[#allocation41_spill]]  ;;  %s219_s21 = scalar_lea.vmem [#allocation8], %s3337_s30 }
  0x29   : > { %s227_s22 = sshll.u32 %s219_s21, 4  ;;  %p3343_p13 = scmp.ge.s32.totalorder %s4723_s17, 1  ;;  %s4862_s22 = int_to_ptr.vmem [resolvable:$true] %s227_s22 }
  0x2a   : > { %p235_p2 = scmp.lt.s32.totalorder %s4723_s17, 3  ;;  %s3334_s1 = sshll.u32 %s4825_s28, 4 }
  0x2b   : > { %s3869_s20 = sshll.u32 %s4719_s16, 8  ;;  %s172_s6 = scalar_lea.sflag [#allocation4], %s4825_s28 }
  0x2c   : > { %p4865_p3 = pnand %p3343_p13, %p235_p2  ;;  %s182_s7 = scalar_lea.hbm %s7231_s0, %s3869_s20 }
  0x2d   : > { %s4728_s21 = smov [#allocation3]  }
  0x2e   : > { %s4857_s19 = scalar_lea.hbm %s7247_s2, %s3870_s5  ;;  %s175_s5 = scalar_lea.vmem [#allocation3], %s3334_s1 }
  0x2f   : > { %s183_s9 = sshll.u32 %s175_s5, 4  ;;  %s4601_s29 = sshll.u32 %s4728_s21, 4  ;;  %s184_s9 = int_to_ptr.vmem [resolvable:$true] %s183_s9  ;;  %s4602_s29 = int_to_ptr.vmem [resolvable:$false] %s4601_s29 }
  0x30   : > { %s4596_s30 = scalar_lea.vmem %s184_s9, 256  ;;  %s4603_s2 = scalar_lea.vmem %s4602_s29, 512 }
  0x31   : > { %p4597_p4 = scmp.ne.s32.totalorder %s184_s9, %s4596_s30  ;;  %p4604_p7 = scmp.lt.s32.totalorder %s184_s9, %s4602_s29 }
  0x32   : > { %p4605_p10 = scmp.lt.s32.totalorder %s4603_s2, %s4596_s30 }
  0x33   : > { %p4599_p5 = pnand %p4597_p4, %p4557_p1 }
  0x34   : > { %p4606_p13 = por %p4605_p10, %p4604_p7 }
  0x35   : > { %p4600_p6 = pneg %p4599_p5 }
  0x37   : > { %p4607_p2 = pnand %p4606_p13, %p4600_p6 }
  0x39   : > { %4610 = shalt.err (!%p4607_p2)
}
  0x3a   : > { %s4729_s20 = smov 128   ;;  %s4730_s1 = smov 8  }
  0x3b   : > { %4479 = dma.hbm_to_vmem [thread:$0]  (!%p4831_p0), %s182_s7, 256, %s184_s9, %s172_s6, %s4729_s20, %s4729_s20, %s4730_s1  }
  0x3c   : > { %s4624_s28 = scalar_lea.vmem %s4862_s22, 512  ;;  %s4731_s29 = smov [#allocation8]  }
  0x3d   : > { %p4625_p4 = scmp.ne.s32.totalorder %s4862_s22, %s4624_s28  ;;  %s4629_s2 = sshll.u32 %s4731_s29, 4  ;;  %s4630_s2 = int_to_ptr.vmem [resolvable:$false] %s4629_s2 }
  0x3e   : > { %s4631_s8 = scalar_lea.vmem %s4630_s2, 1024  ;;  %p4632_p6 = scmp.lt.s32.totalorder %s4862_s22, %s4630_s2 }
  0x3f   : > { %p4627_p5 = pnand %p4625_p4, %p4557_p1  ;;  %p4633_p7 = scmp.lt.s32.totalorder %s4631_s8, %s4624_s28 }
  0x41   : > { %p4628_p12 = pneg %p4627_p5  ;;  %p4634_p10 = por %p4633_p7, %p4632_p6 }
  0x43   : > { %p4635_p13 = pnand %p4634_p10, %p4628_p12 }
  0x45   : > { %4638 = shalt.err (!%p4635_p13)
}
  0x46   : > { %s7249_s10 = smov 4   ;;  %s7250_s5 = smov 64  }
  0x47   : > { %4485 = dma.hbm_to_vmem [thread:$0]  (!%p4831_p0), %s4857_s19, 512, %s4862_s22, %s4841_s11, %s7250_s5, %s7250_s5, %s7249_s10  }
  0x48   : > { %239 = sbr.rel (%p4865_p3) target bundleno = 577 (0x241), region = 32 }
  0x4d   : > { %s4897_s6 = sand.u32 1, %s4707_s13  }
  0x4e   : > { %s3344_s7 = sshll.u32 %s4897_s6, 4  ;;  %s242_s9 = scalar_lea.sflag [#allocation4], %s4897_s6 }
  0x4f   : > { %s4901_s30 = scalar_lea.vmem [#allocation3], %s3344_s7 }
  0x50   : > { %4690 = dma.done.wait (%p4807_p8), %s242_s9, 256  }
  0x51   : > { %4692 = vsyncadd (%p4807_p8), %s242_s9, 4294967040  ;;  %s250_s4 = sand.u32 1, %s4787_s18   ;;  %s3345_s11 = sshll.u32 %s4897_s6, 5 }
  0x52   : > { %s251_s19 = scalar_lea.sflag [#allocation7], %s250_s4  ;;  %s4911_s22 = scalar_lea.vmem [#allocation6], %s3345_s11 }
  0x53   : > { %4694 = dma.done.wait (%p4807_p8), %s251_s19, 1024  }
  0x54   : > { %4696 = vsyncadd (%p4807_p8), %s251_s19, 4294966272  ;;  %v440_v0 = vlaneseq  ;;  %v4928_v6 = vld [vmem:[%s4901_s30] sm:$0xff]  ;;  %v4732_v14 = vmov 1.0|1.0   ;;  %v5195_v40 = vld [vmem:[%s4911_s22 + $0x8] sm:$0xff]   ;;  %s7139_s18 = scalar_lea.vmem [#allocation8], %s3345_s11 }
  0x55   : > { %v4937_v9 = vld [vmem:[%s4911_s22] sm:$0xff]   ;;  %v5224_v43 = vld [vmem:[%s4911_s22 + $0x10] sm:$0xff]   ;;  %v5267_v47 = vld [vmem:[%s4911_s22 + $0x18] sm:$0xff]   ;;  %s3347_s24 = sshll.u32 %s4897_s6, 6  ;;  %s3872_s20 = sshll.u32 %s4715_s15, 10 }
  0x56   : > { %v4917_v1 = vshrl.u32 %v440_v0, 7  ;;  %4100 = vmatprep.mubr.bf16.mxu0 %v4937_v9  ;;  %4124 = vmatprep.mubr.bf16.mxu1 %v4937_v9  ;;  %v5837_v53 = vld [vmem:[%s4901_s30 + $0x8] sm:$0xff]  ;;  %v6255_v42 = vld [vmem:[%s4911_s22] sm:$0xff]   ;;  %s7162_s23 = scalar_lea.vmem [#allocation9], %s3347_s24  ;;  %s7181_s29 = scalar_lea.hbm %s7234_s3, %s3872_s20 }
  0x57   : > { %s3195_s21 = sshll.u32 %s7162_s23, 4  ;;  %s3181_s2 = scalar_lea.sflag [#allocation5], %s4897_s6  ;;  %s7175_s21 = int_to_ptr.vmem [resolvable:$true] %s3195_s21 }
  0x58   : > { %v476_v2 = vsub.s32 0, %v4917_v1  ;;  %v649_v3 = vsub.s32 1, %v4917_v1  ;;  %v4922_v4 = vadd.s32 112, %v4917_v1  ;;  %v4925_v5 = vadd.s32 120, %v4917_v1  ;;  %s4639_s8 = scalar_lea.vmem %s7175_s21, 1024  ;;  %s4733_s15 = smov [#allocation9]  }
  0x59   : > { %v4931_v7 = vadd.s32 96, %v4917_v1  ;;  %v4934_v8 = vadd.s32 104, %v4917_v1  ;;  %v4950_v12 = vadd.s32 80, %v4917_v1  ;;  %v4953_v13 = vadd.s32 88, %v4917_v1  ;;  %p4640_p8 = scmp.ne.s32.totalorder %s7175_s21, %s4639_s8  ;;  %s4643_s10 = sshll.u32 %s4733_s15, 4  ;;  %s4644_s10 = int_to_ptr.vmem [resolvable:$false] %s4643_s10 }
  0x5a   : > { %v4942_v10 = vrot.slane %v4928_v6, %v476_v2  ;;  %v4947_v11 = vrot.slane %v4928_v6, %v649_v3  ;;  %v4979_v15 = vadd.s32 64, %v4917_v1  ;;  %v4982_v16 = vadd.s32 72, %v4917_v1  ;;  %s4645_s5 = scalar_lea.vmem %s4644_s10, 2048  ;;  %p4646_p1 = scmp.lt.s32.totalorder %s7175_s21, %s4644_s10 }
  0x5b   : > { %v5012_v19 = vadd.s32 48, %v4917_v1  ;;  %v5015_v20 = vadd.s32 56, %v4917_v1  ;;  %v5042_v23 = vadd.s32 32, %v4917_v1  ;;  %v5045_v24 = vadd.s32 40, %v4917_v1  ;;  %p4641_p12 = pnand %p4640_p8, %p4811_p9  ;;  %p4647_p3 = scmp.lt.s32.totalorder %s4645_s5, %s4639_s8 }
  0x5c   : > { %vm492_vm0 = vcmp.eq.s32.totalorder %v4922_v4, %v4942_v10  ;;  %vm493_vm1 = vcmp.eq.s32.totalorder %v4925_v5, %v4942_v10  ;;  %vm665_vm2 = vcmp.eq.s32.totalorder %v4922_v4, %v4947_v11  ;;  %vm666_vm3 = vcmp.eq.s32.totalorder %v4925_v5, %v4947_v11 }
  0x5d   : > { %vm3368_vm4 = vmpackc.low %vm493_vm1, %vm492_vm0  ;;  %vm490_vm5 = vcmp.eq.s32.totalorder %v4931_v7, %v4942_v10  ;;  %vm491_vm6 = vcmp.eq.s32.totalorder %v4934_v8, %v4942_v10  ;;  %vm663_vm7 = vcmp.eq.s32.totalorder %v4931_v7, %v4947_v11  ;;  %vm664_vm8 = vcmp.eq.s32.totalorder %v4934_v8, %v4947_v11  ;;  %p4642_p0 = pneg %p4641_p12  ;;  %p4648_p2 = por %p4647_p3, %p4646_p1 }
  0x5e   : > { %4084 = vmatprep.subr.msk.bf16.mxu0 %vm3368_vm4, %v4732_v14  ;;  %vm3400_vm9 = vmpackc.low %vm666_vm3, %vm665_vm2  ;;  %vm488_vm10 = vcmp.eq.s32.totalorder %v4950_v12, %v4942_v10  ;;  %vm489_vm11 = vcmp.eq.s32.totalorder %v4953_v13, %v4942_v10  ;;  %vm661_vm13 = vcmp.eq.s32.totalorder %v4950_v12, %v4947_v11  ;;  %vm662_vm14 = vcmp.eq.s32.totalorder %v4953_v13, %v4947_v11 }
  0x5f   : > { %4108 = vmatprep.subr.msk.bf16.mxu1 %vm3400_vm9, %v4732_v14  ;;  %4085 = vmatpush3.bf16.msk.msra.mxu0 %vm3368_vm4, %v4732_v14  ;;  %vm3370_vm12 = vmpackc.low %vm491_vm6, %vm490_vm5  ;;  %vm486_vm2 = vcmp.eq.s32.totalorder %v4979_v15, %v4942_v10  ;;  %vm487_vm3 = vcmp.eq.s32.totalorder %v4982_v16, %v4942_v10  ;;  %vm659_vm4 = vcmp.eq.s32.totalorder %v4979_v15, %v4947_v11  ;;  %v5076_v27 = vadd.s32 16, %v4917_v1  ;;  %p4649_p4 = pnand %p4648_p2, %p4642_p0 }
  0x60   : > { %4109 = vmatpush3.bf16.msk.msra.mxu1 %vm3400_vm9, %v4732_v14  ;;  %4086 = vmatprep.subr.msk.bf16.mxu0 %vm3370_vm12, %v4732_v14  ;;  %vm3402_vm15 = vmpackc.low %vm664_vm8, %vm663_vm7  ;;  %vm660_vm5 = vcmp.eq.s32.totalorder %v4982_v16, %v4947_v11  ;;  %vm484_vm8 = vcmp.eq.s32.totalorder %v5012_v19, %v4942_v10  ;;  %vm485_vm9 = vcmp.eq.s32.totalorder %v5015_v20, %v4942_v10  ;;  %v5079_v28 = vadd.s32 24, %v4917_v1 }
  0x61   : > { %4110 = vmatprep.subr.msk.bf16.mxu1 %vm3402_vm15, %v4732_v14  ;;  %vm4999_vm0 = vmpackc.low %vm489_vm11, %vm488_vm10  ;;  %vm657_vm10 = vcmp.eq.s32.totalorder %v5012_v19, %v4947_v11  ;;  %vm658_vm11 = vcmp.eq.s32.totalorder %v5015_v20, %v4947_v11  ;;  %v5110_v31 = vadd.s32 8, %v4917_v1  ;;  %v799_v32 = vsub.s32 2, %v4917_v1 }
  0x62   : > { %vm5003_vm1 = vmpackc.low %vm662_vm14, %vm661_vm13  ;;  %vm482_vm14 = vcmp.eq.s32.totalorder %v5042_v23, %v4942_v10  ;;  %v949_v33 = vsub.s32 3, %v4917_v1  ;;  %v1099_v54 = vsub.s32 4, %v4917_v1  ;;  %v1249_v55 = vsub.s32 5, %v4917_v1 }
  0x63   : > { %4087 = vmatpush3.bf16.msk.msra.mxu0 %vm3370_vm12, %v4732_v14  ;;  %vm5029_vm6 = vmpackc.low %vm487_vm3, %vm486_vm2  ;;  %v5145_v36 = vrot.slane %v4928_v6, %v799_v32  ;;  %v1399_v29 = vsub.s32 6, %v4917_v1  ;;  %v1549_v30 = vsub.s32 7, %v4917_v1  ;;  %v6091_v25 = vrot.slane %v5837_v53, %v799_v32  ;;  %v6713_v32 = vld [vmem:[%s4911_s22 + $0x18] sm:$0xff]  }
  0x64   : > { %4111 = vmatpush3.bf16.msk.msra.mxu1 %vm3402_vm15, %v4732_v14  ;;  %4088 = vmatprep.subr.msk.bf16.mxu0 %vm4999_vm0, %v4732_v14  ;;  %vm5033_vm7 = vmpackc.low %vm660_vm5, %vm659_vm4  ;;  %vm483_vm15 = vcmp.eq.s32.totalorder %v5045_v24, %v4942_v10  ;;  %vm480_vm4 = vcmp.eq.s32.totalorder %v5076_v27, %v4942_v10  ;;  %vm481_vm5 = vcmp.eq.s32.totalorder %v5079_v28, %v4942_v10 }
  0x65   : > { %4112 = vmatprep.subr.msk.bf16.mxu1 %vm5003_vm1, %v4732_v14  ;;  %vm5063_vm12 = vmpackc.low %vm485_vm9, %vm484_vm8  ;;  %v5157_v37 = vrot.slane %v4928_v6, %v949_v33  ;;  %v5390_v58 = vrot.slane %v4928_v6, %v1099_v54  ;;  %v5402_v59 = vrot.slane %v4928_v6, %v1249_v55  ;;  %v6101_v26 = vrot.slane %v5837_v53, %v949_v33 }
  0x66   : > { %vm5067_vm13 = vmpackc.low %vm658_vm11, %vm657_vm10  ;;  %vm478_vm10 = vcmp.eq.s32.totalorder %v4917_v1, %v4942_v10  ;;  %vm479_vm11 = vcmp.eq.s32.totalorder %v5110_v31, %v4942_v10  ;;  %v6320_v49 = vrot.slane %v5837_v53, %v1099_v54  ;;  %v6330_v50 = vrot.slane %v5837_v53, %v1249_v55 }
  0x67   : > { %4089 = vmatpush3.bf16.msk.msra.mxu0 %vm4999_vm0, %v4732_v14  ;;  %vm655_vm0 = vcmp.eq.s32.totalorder %v5042_v23, %v4947_v11  ;;  %vm5097_vm2 = vmpackc.low %vm483_vm15, %vm482_vm14  ;;  %v6546_v61 = vrot.slane %v5837_v53, %v1399_v29  ;;  %v6556_v62 = vrot.slane %v5837_v53, %v1549_v30 }
  0x68   : > { %4113 = vmatpush3.bf16.msk.msra.mxu1 %vm5003_vm1, %v4732_v14  ;;  %4090 = vmatprep.subr.msk.bf16.mxu0 %vm5029_vm6, %v4732_v14  ;;  %vm656_vm1 = vcmp.eq.s32.totalorder %v5045_v24, %v4947_v11  ;;  %vm5130_vm8 = vmpackc.low %vm481_vm5, %vm480_vm4 }
  0x69   : > { %4114 = vmatprep.subr.msk.bf16.mxu1 %vm5033_vm7, %v4732_v14  ;;  %vm5101_vm3 = vmpackc.low %vm656_vm1, %vm655_vm0  ;;  %vm815_vm0 = vcmp.eq.s32.totalorder %v4922_v4, %v5145_v36  ;;  %vm816_vm1 = vcmp.eq.s32.totalorder %v4925_v5, %v5145_v36 }
  0x6a   : > { %vm3382_vm14 = vmpackc.low %vm479_vm11, %vm478_vm10 }
  0x6b   : > { %4091 = vmatpush3.bf16.msk.msra.mxu0 %vm5029_vm6, %v4732_v14  ;;  %vm653_vm6 = vcmp.eq.s32.totalorder %v5076_v27, %v4947_v11  ;;  %vm5190_vm4 = vmpackc.low %vm816_vm1, %vm815_vm0 }
  0x6c   : > { %4115 = vmatpush3.bf16.msk.msra.mxu1 %vm5033_vm7, %v4732_v14  ;;  %4092 = vmatprep.subr.msk.bf16.mxu0 %vm5063_vm12, %v4732_v14  ;;  %vm654_vm7 = vcmp.eq.s32.totalorder %v5079_v28, %v4947_v11 }
  0x6d   : > { %4116 = vmatprep.subr.msk.bf16.mxu1 %vm5067_vm13, %v4732_v14  ;;  %vm5134_vm9 = vmpackc.low %vm654_vm7, %vm653_vm6  ;;  %vm813_vm6 = vcmp.eq.s32.totalorder %v4931_v7, %v5145_v36  ;;  %vm814_vm7 = vcmp.eq.s32.totalorder %v4934_v8, %v5145_v36 }
  0x6e   : > { %vm5219_vm10 = vmpackc.low %vm814_vm7, %vm813_vm6 }
  0x6f   : > { %4093 = vmatpush3.bf16.msk.msra.mxu0 %vm5063_vm12, %v4732_v14  ;;  %vm651_vm12 = vcmp.eq.s32.totalorder %v4917_v1, %v4947_v11 }
  0x70   : > { %4117 = vmatpush3.bf16.msk.msra.mxu1 %vm5067_vm13, %v4732_v14  ;;  %4094 = vmatprep.subr.msk.bf16.mxu0 %vm5097_vm2, %v4732_v14  ;;  %vm652_vm13 = vcmp.eq.s32.totalorder %v5110_v31, %v4947_v11 }
  0x71   : > { %4118 = vmatprep.subr.msk.bf16.mxu1 %vm5101_vm3, %v4732_v14  ;;  %vm5168_vm15 = vmpackc.low %vm652_vm13, %vm651_vm12  ;;  %vm811_vm12 = vcmp.eq.s32.totalorder %v4950_v12, %v5145_v36  ;;  %vm812_vm13 = vcmp.eq.s32.totalorder %v4953_v13, %v5145_v36 }
  0x72   : > { %vm5252_vm0 = vmpackc.low %vm812_vm13, %vm811_vm12 }
  0x73   : > { %4095 = vmatpush3.bf16.msk.msra.mxu0 %vm5097_vm2, %v4732_v14  ;;  %vm965_vm2 = vcmp.eq.s32.totalorder %v4922_v4, %v5157_v37 }
  0x74   : > { %4119 = vmatpush3.bf16.msk.msra.mxu1 %vm5101_vm3, %v4732_v14  ;;  %4096 = vmatprep.subr.msk.bf16.mxu0 %vm5130_vm8, %v4732_v14  ;;  %vm966_vm3 = vcmp.eq.s32.totalorder %v4925_v5, %v5157_v37 }
  0x75   : > { %4120 = vmatprep.subr.msk.bf16.mxu1 %vm5134_vm9, %v4732_v14  ;;  %vm5197_vm5 = vmpackc.low %vm966_vm3, %vm965_vm2  ;;  %vm809_vm2 = vcmp.eq.s32.totalorder %v4979_v15, %v5145_v36  ;;  %vm810_vm3 = vcmp.eq.s32.totalorder %v4982_v16, %v5145_v36 }
  0x76   : > { %vm5285_vm6 = vmpackc.low %vm810_vm3, %vm809_vm2 }
  0x77   : > { %4097 = vmatpush3.bf16.msk.msra.mxu0 %vm5130_vm8, %v4732_v14  ;;  %vm963_vm8 = vcmp.eq.s32.totalorder %v4931_v7, %v5157_v37 }
  0x78   : > { %4121 = vmatpush3.bf16.msk.msra.mxu1 %vm5134_vm9, %v4732_v14  ;;  %4098 = vmatprep.subr.msk.bf16.mxu0 %vm3382_vm14, %v4732_v14  ;;  %vm964_vm9 = vcmp.eq.s32.totalorder %v4934_v8, %v5157_v37 }
  0x79   : > { %4122 = vmatprep.subr.msk.bf16.mxu1 %vm5168_vm15, %v4732_v14  ;;  %vm5227_vm11 = vmpackc.low %vm964_vm9, %vm963_vm8  ;;  %vm807_vm8 = vcmp.eq.s32.totalorder %v5012_v19, %v5145_v36  ;;  %vm808_vm9 = vcmp.eq.s32.totalorder %v5015_v20, %v5145_v36 }
  0x7a   : > { %vm5315_vm12 = vmpackc.low %vm808_vm9, %vm807_vm8 }
  0x7b   : > { %4099 = vmatpush3.bf16.msk.msra.mxu0 %vm3382_vm14, %v4732_v14  ;;  %vm961_vm14 = vcmp.eq.s32.totalorder %v4950_v12, %v5157_v37 }
  0x7c   : > { %4123 = vmatpush3.bf16.msk.msra.mxu1 %vm5168_vm15, %v4732_v14  ;;  %4132 = vmatprep.subr.msk.bf16.mxu0 %vm5190_vm4, %v4732_v14  ;;  %vm962_vm15 = vcmp.eq.s32.totalorder %v4953_v13, %v5157_v37 }
  0x7d   : > { %4156 = vmatprep.subr.msk.bf16.mxu1 %vm5197_vm5, %v4732_v14  ;;  %vm5257_vm1 = vmpackc.low %vm962_vm15, %vm961_vm14  ;;  %vm805_vm14 = vcmp.eq.s32.totalorder %v5042_v23, %v5145_v36  ;;  %vm806_vm15 = vcmp.eq.s32.totalorder %v5045_v24, %v5145_v36 }
  0x7e   : > { %4101 = vmatmul.mubr.bf16.vlgmr.msra.gmra.mxu0 %v5195_v40  ;;  %vm5345_vm2 = vmpackc.low %vm806_vm15, %vm805_vm14 }
  0x7f   : > { %4125 = vmatmul.mubr.bf16.vlgmr.msra.gmra.mxu1 %v5195_v40  ;;  %4133 = vmatpush3.bf16.msk.msra.mxu0 %vm5190_vm4, %v4732_v14  ;;  %vm959_vm4 = vcmp.eq.s32.totalorder %v4979_v15, %v5157_v37 }
  0x80   : > { %4157 = vmatpush3.bf16.msk.msra.mxu1 %vm5197_vm5, %v4732_v14  ;;  %4134 = vmatprep.subr.msk.bf16.mxu0 %vm5219_vm10, %v4732_v14  ;;  %vm960_vm5 = vcmp.eq.s32.totalorder %v4982_v16, %v5157_v37 }
  0x81   : > { %4158 = vmatprep.subr.msk.bf16.mxu1 %vm5227_vm11, %v4732_v14  ;;  %4104 = vmatprep.mubr.bf16.mxu0 %v5224_v43  ;;  %vm5289_vm7 = vmpackc.low %vm960_vm5, %vm959_vm4  ;;  %vm803_vm4 = vcmp.eq.s32.totalorder %v5076_v27, %v5145_v36  ;;  %vm804_vm5 = vcmp.eq.s32.totalorder %v5079_v28, %v5145_v36 }
  0x82   : > { %4128 = vmatprep.mubr.bf16.mxu1 %v5224_v43  ;;  %vm5375_vm8 = vmpackc.low %vm804_vm5, %vm803_vm4 }
  0x83   : > { %4135 = vmatpush3.bf16.msk.msra.mxu0 %vm5219_vm10, %v4732_v14  ;;  %vm957_vm10 = vcmp.eq.s32.totalorder %v5012_v19, %v5157_v37 }
  0x84   : > { %4159 = vmatpush3.bf16.msk.msra.mxu1 %vm5227_vm11, %v4732_v14  ;;  %4136 = vmatprep.subr.msk.bf16.mxu0 %vm5252_vm0, %v4732_v14  ;;  %vm958_vm11 = vcmp.eq.s32.totalorder %v5015_v20, %v5157_v37 }
  0x85   : > { %4160 = vmatprep.subr.msk.bf16.mxu1 %vm5257_vm1, %v4732_v14  ;;  %vm5320_vm13 = vmpackc.low %vm958_vm11, %vm957_vm10  ;;  %vm801_vm10 = vcmp.eq.s32.totalorder %v4917_v1, %v5145_v36  ;;  %vm802_vm11 = vcmp.eq.s32.totalorder %v5110_v31, %v5145_v36  ;;  %v5626_v36 = vrot.slane %v4928_v6, %v1399_v29 }
  0x86   : > { %4105 = vmatmul.mubr.bf16.gmra.mxu0 %v5267_v47  ;;  %vm3446_vm14 = vmpackc.low %vm802_vm11, %vm801_vm10 }
  0x87   : > { %4137 = vmatpush3.bf16.msk.msra.mxu0 %vm5252_vm0, %v4732_v14  ;;  %4129 = vmatmul.mubr.bf16.gmra.mxu1 %v5267_v47  ;;  %vm955_vm0 = vcmp.eq.s32.totalorder %v5042_v23, %v5157_v37 }
  0x88   : > { %4161 = vmatpush3.bf16.msk.msra.mxu1 %vm5257_vm1, %v4732_v14  ;;  %4138 = vmatprep.subr.msk.bf16.mxu0 %vm5285_vm6, %v4732_v14  ;;  %vm956_vm1 = vcmp.eq.s32.totalorder %v5045_v24, %v5157_v37 }
  0x89   : > { %4162 = vmatprep.subr.msk.bf16.mxu1 %vm5289_vm7, %v4732_v14  ;;  %4148 = vmatprep.mubr.bf16.mxu0 %v4937_v9  ;;  %vm5349_vm3 = vmpackc.low %vm956_vm1, %vm955_vm0  ;;  %vm1115_vm0 = vcmp.eq.s32.totalorder %v4922_v4, %v5390_v58  ;;  %vm1116_vm1 = vcmp.eq.s32.totalorder %v4925_v5, %v5390_v58 }
  0x8a   : > { %4172 = vmatprep.mubr.bf16.mxu1 %v4937_v9  ;;  %vm5435_vm4 = vmpackc.low %vm1116_vm1, %vm1115_vm0 }
  0x8b   : > { %4139 = vmatpush3.bf16.msk.msra.mxu0 %vm5285_vm6, %v4732_v14  ;;  %vm953_vm6 = vcmp.eq.s32.totalorder %v5076_v27, %v5157_v37 }
  0x8c   : > { %4163 = vmatpush3.bf16.msk.msra.mxu1 %vm5289_vm7, %v4732_v14  ;;  %4140 = vmatprep.subr.msk.bf16.mxu0 %vm5315_vm12, %v4732_v14  ;;  %vm954_vm7 = vcmp.eq.s32.totalorder %v5079_v28, %v5157_v37 }
  0x8d   : > { %4164 = vmatprep.subr.msk.bf16.mxu1 %vm5320_vm13, %v4732_v14  ;;  %vm5379_vm9 = vmpackc.low %vm954_vm7, %vm953_vm6  ;;  %vm1113_vm6 = vcmp.eq.s32.totalorder %v4931_v7, %v5390_v58  ;;  %vm1114_vm7 = vcmp.eq.s32.totalorder %v4934_v8, %v5390_v58 }
  0x8e   : > { %vm5461_vm10 = vmpackc.low %vm1114_vm7, %vm1113_vm6 }
  0x8f   : > { %4141 = vmatpush3.bf16.msk.msra.mxu0 %vm5315_vm12, %v4732_v14  ;;  %vm951_vm12 = vcmp.eq.s32.totalorder %v4917_v1, %v5157_v37 }
  0x90   : > { %4165 = vmatpush3.bf16.msk.msra.mxu1 %vm5320_vm13, %v4732_v14  ;;  %4142 = vmatprep.subr.msk.bf16.mxu0 %vm5345_vm2, %v4732_v14  ;;  %vm952_vm13 = vcmp.eq.s32.totalorder %v5110_v31, %v5157_v37  ;;  %v5638_v37 = vrot.slane %v4928_v6, %v1549_v30 }
  0x91   : > { %4166 = vmatprep.subr.msk.bf16.mxu1 %vm5349_vm3, %v4732_v14  ;;  %vm5413_vm15 = vmpackc.low %vm952_vm13, %vm951_vm12  ;;  %vm1111_vm12 = vcmp.eq.s32.totalorder %v4950_v12, %v5390_v58  ;;  %vm1112_vm13 = vcmp.eq.s32.totalorder %v4953_v13, %v5390_v58 }
  0x92   : > { %vm5492_vm0 = vmpackc.low %vm1112_vm13, %vm1111_vm12 }
  0x93   : > { %4143 = vmatpush3.bf16.msk.msra.mxu0 %vm5345_vm2, %v4732_v14  ;;  %vm1265_vm2 = vcmp.eq.s32.totalorder %v4922_v4, %v5402_v59 }
  0x94   : > { %4167 = vmatpush3.bf16.msk.msra.mxu1 %vm5349_vm3, %v4732_v14  ;;  %4144 = vmatprep.subr.msk.bf16.mxu0 %vm5375_vm8, %v4732_v14  ;;  %vm1266_vm3 = vcmp.eq.s32.totalorder %v4925_v5, %v5402_v59 }
  0x95   : > { %4168 = vmatprep.subr.msk.bf16.mxu1 %vm5379_vm9, %v4732_v14  ;;  %vm5439_vm5 = vmpackc.low %vm1266_vm3, %vm1265_vm2  ;;  %vm1109_vm2 = vcmp.eq.s32.totalorder %v4979_v15, %v5390_v58  ;;  %vm1110_vm3 = vcmp.eq.s32.totalorder %v4982_v16, %v5390_v58 }
  0x96   : > { %vm5521_vm6 = vmpackc.low %vm1110_vm3, %vm1109_vm2 }
  0x97   : > { %4145 = vmatpush3.bf16.msk.msra.mxu0 %vm5375_vm8, %v4732_v14  ;;  %vm1263_vm8 = vcmp.eq.s32.totalorder %v4931_v7, %v5402_v59 }
  0x98   : > { %4169 = vmatpush3.bf16.msk.msra.mxu1 %vm5379_vm9, %v4732_v14  ;;  %4146 = vmatprep.subr.msk.bf16.mxu0 %vm3446_vm14, %v4732_v14  ;;  %vm1264_vm9 = vcmp.eq.s32.totalorder %v4934_v8, %v5402_v59 }
  0x99   : > { %4170 = vmatprep.subr.msk.bf16.mxu1 %vm5413_vm15, %v4732_v14  ;;  %vm5466_vm11 = vmpackc.low %vm1264_vm9, %vm1263_vm8  ;;  %vm1107_vm8 = vcmp.eq.s32.totalorder %v5012_v19, %v5390_v58  ;;  %vm1108_vm9 = vcmp.eq.s32.totalorder %v5015_v20, %v5390_v58 }
  0x9a   : > { %vm5551_vm12 = vmpackc.low %vm1108_vm9, %vm1107_vm8 }
  0x9b   : > { %4147 = vmatpush3.bf16.msk.msra.mxu0 %vm3446_vm14, %v4732_v14  ;;  %vm1261_vm14 = vcmp.eq.s32.totalorder %v4950_v12, %v5402_v59 }
  0x9c   : > { %4171 = vmatpush3.bf16.msk.msra.mxu1 %vm5413_vm15, %v4732_v14  ;;  %4180 = vmatprep.subr.msk.bf16.mxu0 %vm5435_vm4, %v4732_v14  ;;  %vm1262_vm15 = vcmp.eq.s32.totalorder %v4953_v13, %v5402_v59 }
  0x9d   : > { %4204 = vmatprep.subr.msk.bf16.mxu1 %vm5439_vm5, %v4732_v14  ;;  %vm5496_vm1 = vmpackc.low %vm1262_vm15, %vm1261_vm14  ;;  %vm1105_vm14 = vcmp.eq.s32.totalorder %v5042_v23, %v5390_v58  ;;  %vm1106_vm15 = vcmp.eq.s32.totalorder %v5045_v24, %v5390_v58 }
  0x9e   : > { %4149 = vmatmul.mubr.bf16.vlgmr.msra.gmra.mxu0 %v5195_v40  ;;  %vm5581_vm2 = vmpackc.low %vm1106_vm15, %vm1105_vm14 }
  0x9f   : > { %4173 = vmatmul.mubr.bf16.vlgmr.msra.gmra.mxu1 %v5195_v40  ;;  %4181 = vmatpush3.bf16.msk.msra.mxu0 %vm5435_vm4, %v4732_v14  ;;  %vm1259_vm4 = vcmp.eq.s32.totalorder %v4979_v15, %v5402_v59 }
  0xa0   : > { %4205 = vmatpush3.bf16.msk.msra.mxu1 %vm5439_vm5, %v4732_v14  ;;  %4182 = vmatprep.subr.msk.bf16.mxu0 %vm5461_vm10, %v4732_v14  ;;  %vm1260_vm5 = vcmp.eq.s32.totalorder %v4982_v16, %v5402_v59 }
  0xa1   : > { %4206 = vmatprep.subr.msk.bf16.mxu1 %vm5466_vm11, %v4732_v14  ;;  %4152 = vmatprep.mubr.bf16.mxu0 %v5224_v43  ;;  %vm5526_vm7 = vmpackc.low %vm1260_vm5, %vm1259_vm4  ;;  %vm1103_vm4 = vcmp.eq.s32.totalorder %v5076_v27, %v5390_v58  ;;  %vm1104_vm5 = vcmp.eq.s32.totalorder %v5079_v28, %v5390_v58 }
  0xa2   : > { %4176 = vmatprep.mubr.bf16.mxu1 %v5224_v43  ;;  %vm5611_vm8 = vmpackc.low %vm1104_vm5, %vm1103_vm4 }
  0xa3   : > { %4183 = vmatpush3.bf16.msk.msra.mxu0 %vm5461_vm10, %v4732_v14  ;;  %vm1257_vm10 = vcmp.eq.s32.totalorder %v5012_v19, %v5402_v59 }
  0xa4   : > { %4207 = vmatpush3.bf16.msk.msra.mxu1 %vm5466_vm11, %v4732_v14  ;;  %4184 = vmatprep.subr.msk.bf16.mxu0 %vm5492_vm0, %v4732_v14  ;;  %vm1258_vm11 = vcmp.eq.s32.totalorder %v5015_v20, %v5402_v59 }
  0xa5   : > { %4208 = vmatprep.subr.msk.bf16.mxu1 %vm5496_vm1, %v4732_v14  ;;  %vm5556_vm13 = vmpackc.low %vm1258_vm11, %vm1257_vm10  ;;  %vm1101_vm10 = vcmp.eq.s32.totalorder %v4917_v1, %v5390_v58  ;;  %vm1102_vm11 = vcmp.eq.s32.totalorder %v5110_v31, %v5390_v58  ;;  %v5863_v58 = vrot.slane %v5837_v53, %v476_v2 }
  0xa6   : > { %4153 = vmatmul.mubr.bf16.gmra.mxu0 %v5267_v47  ;;  %vm3510_vm14 = vmpackc.low %vm1102_vm11, %vm1101_vm10 }
  0xa7   : > { %4185 = vmatpush3.bf16.msk.msra.mxu0 %vm5492_vm0, %v4732_v14  ;;  %4177 = vmatmul.mubr.bf16.gmra.mxu1 %v5267_v47  ;;  %vm1255_vm0 = vcmp.eq.s32.totalorder %v5042_v23, %v5402_v59 }
  0xa8   : > { %4209 = vmatpush3.bf16.msk.msra.mxu1 %vm5496_vm1, %v4732_v14  ;;  %4186 = vmatprep.subr.msk.bf16.mxu0 %vm5521_vm6, %v4732_v14  ;;  %vm1256_vm1 = vcmp.eq.s32.totalorder %v5045_v24, %v5402_v59 }
  0xa9   : > { %4210 = vmatprep.subr.msk.bf16.mxu1 %vm5526_vm7, %v4732_v14  ;;  %4196 = vmatprep.mubr.bf16.mxu0 %v4937_v9  ;;  %vm5585_vm3 = vmpackc.low %vm1256_vm1, %vm1255_vm0  ;;  %vm1415_vm0 = vcmp.eq.s32.totalorder %v4922_v4, %v5626_v36  ;;  %vm1416_vm1 = vcmp.eq.s32.totalorder %v4925_v5, %v5626_v36 }
  0xaa   : > { %4220 = vmatprep.mubr.bf16.mxu1 %v4937_v9  ;;  %vm5671_vm4 = vmpackc.low %vm1416_vm1, %vm1415_vm0 }
  0xab   : > { %4187 = vmatpush3.bf16.msk.msra.mxu0 %vm5521_vm6, %v4732_v14  ;;  %vm1253_vm6 = vcmp.eq.s32.totalorder %v5076_v27, %v5402_v59 }
  0xac   : > { %4211 = vmatpush3.bf16.msk.msra.mxu1 %vm5526_vm7, %v4732_v14  ;;  %4188 = vmatprep.subr.msk.bf16.mxu0 %vm5551_vm12, %v4732_v14  ;;  %vm1254_vm7 = vcmp.eq.s32.totalorder %v5079_v28, %v5402_v59 }
  0xad   : > { %4212 = vmatprep.subr.msk.bf16.mxu1 %vm5556_vm13, %v4732_v14  ;;  %vm5615_vm9 = vmpackc.low %vm1254_vm7, %vm1253_vm6  ;;  %vm1413_vm6 = vcmp.eq.s32.totalorder %v4931_v7, %v5626_v36  ;;  %vm1414_vm7 = vcmp.eq.s32.totalorder %v4934_v8, %v5626_v36 }
  0xae   : > { %vm5697_vm10 = vmpackc.low %vm1414_vm7, %vm1413_vm6 }
  0xaf   : > { %4189 = vmatpush3.bf16.msk.msra.mxu0 %vm5551_vm12, %v4732_v14  ;;  %vm1251_vm12 = vcmp.eq.s32.totalorder %v4917_v1, %v5402_v59 }
  0xb0   : > { %4213 = vmatpush3.bf16.msk.msra.mxu1 %vm5556_vm13, %v4732_v14  ;;  %4190 = vmatprep.subr.msk.bf16.mxu0 %vm5581_vm2, %v4732_v14  ;;  %vm1252_vm13 = vcmp.eq.s32.totalorder %v5110_v31, %v5402_v59  ;;  %v5875_v59 = vrot.slane %v5837_v53, %v649_v3  ;;  %v6622_v53 = vld [vmem:[%s4911_s22 + $0x8] sm:$0xff]  }
  0xb1   : > { %4214 = vmatprep.subr.msk.bf16.mxu1 %vm5585_vm3, %v4732_v14  ;;  %vm5649_vm15 = vmpackc.low %vm1252_vm13, %vm1251_vm12  ;;  %vm1411_vm12 = vcmp.eq.s32.totalorder %v4950_v12, %v5626_v36  ;;  %vm1412_vm13 = vcmp.eq.s32.totalorder %v4953_v13, %v5626_v36 }
  0xb2   : > { %vm5728_vm0 = vmpackc.low %vm1412_vm13, %vm1411_vm12 }
  0xb3   : > { %4191 = vmatpush3.bf16.msk.msra.mxu0 %vm5581_vm2, %v4732_v14  ;;  %vm1565_vm2 = vcmp.eq.s32.totalorder %v4922_v4, %v5638_v37 }
  0xb4   : > { %4215 = vmatpush3.bf16.msk.msra.mxu1 %vm5585_vm3, %v4732_v14  ;;  %4192 = vmatprep.subr.msk.bf16.mxu0 %vm5611_vm8, %v4732_v14  ;;  %vm1566_vm3 = vcmp.eq.s32.totalorder %v4925_v5, %v5638_v37 }
  0xb5   : > { %4216 = vmatprep.subr.msk.bf16.mxu1 %vm5615_vm9, %v4732_v14  ;;  %vm5675_vm5 = vmpackc.low %vm1566_vm3, %vm1565_vm2  ;;  %vm1409_vm2 = vcmp.eq.s32.totalorder %v4979_v15, %v5626_v36  ;;  %vm1410_vm3 = vcmp.eq.s32.totalorder %v4982_v16, %v5626_v36 }
  0xb6   : > { %vm5757_vm6 = vmpackc.low %vm1410_vm3, %vm1409_vm2 }
  0xb7   : > { %4193 = vmatpush3.bf16.msk.msra.mxu0 %vm5611_vm8, %v4732_v14  ;;  %vm1563_vm8 = vcmp.eq.s32.totalorder %v4931_v7, %v5638_v37 }
  0xb8   : > { %4217 = vmatpush3.bf16.msk.msra.mxu1 %vm5615_vm9, %v4732_v14  ;;  %4194 = vmatprep.subr.msk.bf16.mxu0 %vm3510_vm14, %v4732_v14  ;;  %vm1564_vm9 = vcmp.eq.s32.totalorder %v4934_v8, %v5638_v37 }
  0xb9   : > { %4218 = vmatprep.subr.msk.bf16.mxu1 %vm5649_vm15, %v4732_v14  ;;  %vm5702_vm11 = vmpackc.low %vm1564_vm9, %vm1563_vm8  ;;  %vm1407_vm8 = vcmp.eq.s32.totalorder %v5012_v19, %v5626_v36  ;;  %vm1408_vm9 = vcmp.eq.s32.totalorder %v5015_v20, %v5626_v36 }
  0xba   : > { %vm5787_vm12 = vmpackc.low %vm1408_vm9, %vm1407_vm8 }
  0xbb   : > { %4195 = vmatpush3.bf16.msk.msra.mxu0 %vm3510_vm14, %v4732_v14  ;;  %vm1561_vm14 = vcmp.eq.s32.totalorder %v4950_v12, %v5638_v37 }
  0xbc   : > { %4219 = vmatpush3.bf16.msk.msra.mxu1 %vm5649_vm15, %v4732_v14  ;;  %4228 = vmatprep.subr.msk.bf16.mxu0 %vm5671_vm4, %v4732_v14  ;;  %vm1562_vm15 = vcmp.eq.s32.totalorder %v4953_v13, %v5638_v37 }
  0xbd   : > { %4252 = vmatprep.subr.msk.bf16.mxu1 %vm5675_vm5, %v4732_v14  ;;  %vm5732_vm1 = vmpackc.low %vm1562_vm15, %vm1561_vm14  ;;  %vm1405_vm14 = vcmp.eq.s32.totalorder %v5042_v23, %v5626_v36  ;;  %vm1406_vm15 = vcmp.eq.s32.totalorder %v5045_v24, %v5626_v36 }
  0xbe   : > { %4197 = vmatmul.mubr.bf16.vlgmr.msra.gmra.mxu0 %v5195_v40  ;;  %vm5817_vm2 = vmpackc.low %vm1406_vm15, %vm1405_vm14 }
  0xbf   : > { %4221 = vmatmul.mubr.bf16.vlgmr.msra.gmra.mxu1 %v5195_v40  ;;  %4229 = vmatpush3.bf16.msk.msra.mxu0 %vm5671_vm4, %v4732_v14  ;;  %vm1559_vm4 = vcmp.eq.s32.totalorder %v4979_v15, %v5638_v37 }
  0xc0   : > { %4253 = vmatpush3.bf16.msk.msra.mxu1 %vm5675_vm5, %v4732_v14  ;;  %4230 = vmatprep.subr.msk.bf16.mxu0 %vm5697_vm10, %v4732_v14  ;;  %vm1560_vm5 = vcmp.eq.s32.totalorder %v4982_v16, %v5638_v37 }
  0xc1   : > { %4254 = vmatprep.subr.msk.bf16.mxu1 %vm5702_vm11, %v4732_v14  ;;  %4200 = vmatprep.mubr.bf16.mxu0 %v5224_v43  ;;  %vm5762_vm7 = vmpackc.low %vm1560_vm5, %vm1559_vm4  ;;  %vm1403_vm4 = vcmp.eq.s32.totalorder %v5076_v27, %v5626_v36  ;;  %vm1404_vm5 = vcmp.eq.s32.totalorder %v5079_v28, %v5626_v36 }
  0xc2   : > { %4224 = vmatprep.mubr.bf16.mxu1 %v5224_v43  ;;  %vm5848_vm8 = vmpackc.low %vm1404_vm5, %vm1403_vm4 }
  0xc3   : > { %4231 = vmatpush3.bf16.msk.msra.mxu0 %vm5697_vm10, %v4732_v14  ;;  %vm1557_vm10 = vcmp.eq.s32.totalorder %v5012_v19, %v5638_v37 }
  0xc4   : > { %4255 = vmatpush3.bf16.msk.msra.mxu1 %vm5702_vm11, %v4732_v14  ;;  %4232 = vmatprep.subr.msk.bf16.mxu0 %vm5728_vm0, %v4732_v14  ;;  %vm1558_vm11 = vcmp.eq.s32.totalorder %v5015_v20, %v5638_v37 }
  0xc5   : > { %4256 = vmatprep.subr.msk.bf16.mxu1 %vm5732_vm1, %v4732_v14  ;;  %vm5792_vm13 = vmpackc.low %vm1558_vm11, %vm1557_vm10  ;;  %vm1401_vm10 = vcmp.eq.s32.totalorder %v4917_v1, %v5626_v36  ;;  %vm1402_vm11 = vcmp.eq.s32.totalorder %v5110_v31, %v5626_v36 }
  0xc6   : > { %4201 = vmatmul.mubr.bf16.gmra.mxu0 %v5267_v47  ;;  %vm3574_vm14 = vmpackc.low %vm1402_vm11, %vm1401_vm10 }
  0xc7   : > { %4233 = vmatpush3.bf16.msk.msra.mxu0 %vm5728_vm0, %v4732_v14  ;;  %4225 = vmatmul.mubr.bf16.gmra.mxu1 %v5267_v47  ;;  %vm1555_vm0 = vcmp.eq.s32.totalorder %v5042_v23, %v5638_v37 }
  0xc8   : > { %4257 = vmatpush3.bf16.msk.msra.mxu1 %vm5732_vm1, %v4732_v14  ;;  %4234 = vmatprep.subr.msk.bf16.mxu0 %vm5757_vm6, %v4732_v14  ;;  %vm1556_vm1 = vcmp.eq.s32.totalorder %v5045_v24, %v5638_v37 }
  0xc9   : > { %4258 = vmatprep.subr.msk.bf16.mxu1 %vm5762_vm7, %v4732_v14  ;;  %4244 = vmatprep.mubr.bf16.mxu0 %v4937_v9  ;;  %vm5821_vm3 = vmpackc.low %vm1556_vm1, %vm1555_vm0  ;;  %vm1715_vm0 = vcmp.eq.s32.totalorder %v4922_v4, %v5863_v58  ;;  %vm1716_vm1 = vcmp.eq.s32.totalorder %v4925_v5, %v5863_v58 }
  0xca   : > { %4268 = vmatprep.mubr.bf16.mxu1 %v4937_v9  ;;  %vm5908_vm4 = vmpackc.low %vm1716_vm1, %vm1715_vm0 }
  0xcb   : > { %4235 = vmatpush3.bf16.msk.msra.mxu0 %vm5757_vm6, %v4732_v14  ;;  %vm1553_vm6 = vcmp.eq.s32.totalorder %v5076_v27, %v5638_v37 }
  0xcc   : > { %4259 = vmatpush3.bf16.msk.msra.mxu1 %vm5762_vm7, %v4732_v14  ;;  %4236 = vmatprep.subr.msk.bf16.mxu0 %vm5787_vm12, %v4732_v14  ;;  %vm1554_vm7 = vcmp.eq.s32.totalorder %v5079_v28, %v5638_v37 }
  0xcd   : > { %4260 = vmatprep.subr.msk.bf16.mxu1 %vm5792_vm13, %v4732_v14  ;;  %vm5852_vm9 = vmpackc.low %vm1554_vm7, %vm1553_vm6  ;;  %vm1713_vm6 = vcmp.eq.s32.totalorder %v4931_v7, %v5863_v58  ;;  %vm1714_vm7 = vcmp.eq.s32.totalorder %v4934_v8, %v5863_v58 }
  0xce   : > { %vm5934_vm10 = vmpackc.low %vm1714_vm7, %vm1713_vm6 }
  0xcf   : > { %4237 = vmatpush3.bf16.msk.msra.mxu0 %vm5787_vm12, %v4732_v14  ;;  %vm1551_vm12 = vcmp.eq.s32.totalorder %v4917_v1, %v5638_v37 }
  0xd0   : > { %4261 = vmatpush3.bf16.msk.msra.mxu1 %vm5792_vm13, %v4732_v14  ;;  %4238 = vmatprep.subr.msk.bf16.mxu0 %vm5817_vm2, %v4732_v14  ;;  %vm1552_vm13 = vcmp.eq.s32.totalorder %v5110_v31, %v5638_v37 }
  0xd1   : > { %4262 = vmatprep.subr.msk.bf16.mxu1 %vm5821_vm3, %v4732_v14  ;;  %vm5886_vm15 = vmpackc.low %vm1552_vm13, %vm1551_vm12  ;;  %vm1711_vm12 = vcmp.eq.s32.totalorder %v4950_v12, %v5863_v58  ;;  %vm1712_vm13 = vcmp.eq.s32.totalorder %v4953_v13, %v5863_v58 }
  0xd2   : > { %vm5965_vm0 = vmpackc.low %vm1712_vm13, %vm1711_vm12 }
  0xd3   : > { %4239 = vmatpush3.bf16.msk.msra.mxu0 %vm5817_vm2, %v4732_v14  ;;  %vm1865_vm2 = vcmp.eq.s32.totalorder %v4922_v4, %v5875_v59 }
  0xd4   : > { %4263 = vmatpush3.bf16.msk.msra.mxu1 %vm5821_vm3, %v4732_v14  ;;  %4240 = vmatprep.subr.msk.bf16.mxu0 %vm5848_vm8, %v4732_v14  ;;  %vm1866_vm3 = vcmp.eq.s32.totalorder %v4925_v5, %v5875_v59 }
  0xd5   : > { %4264 = vmatprep.subr.msk.bf16.mxu1 %vm5852_vm9, %v4732_v14  ;;  %vm5912_vm5 = vmpackc.low %vm1866_vm3, %vm1865_vm2  ;;  %vm1709_vm2 = vcmp.eq.s32.totalorder %v4979_v15, %v5863_v58  ;;  %vm1710_vm3 = vcmp.eq.s32.totalorder %v4982_v16, %v5863_v58 }
  0xd6   : > { %vm5994_vm6 = vmpackc.low %vm1710_vm3, %vm1709_vm2 }
  0xd7   : > { %4241 = vmatpush3.bf16.msk.msra.mxu0 %vm5848_vm8, %v4732_v14  ;;  %vm1863_vm8 = vcmp.eq.s32.totalorder %v4931_v7, %v5875_v59 }
  0xd8   : > { %4265 = vmatpush3.bf16.msk.msra.mxu1 %vm5852_vm9, %v4732_v14  ;;  %4242 = vmatprep.subr.msk.bf16.mxu0 %vm3574_vm14, %v4732_v14  ;;  %vm1864_vm9 = vcmp.eq.s32.totalorder %v4934_v8, %v5875_v59 }
  0xd9   : > { %4266 = vmatprep.subr.msk.bf16.mxu1 %vm5886_vm15, %v4732_v14  ;;  %vm5939_vm11 = vmpackc.low %vm1864_vm9, %vm1863_vm8  ;;  %vm1707_vm8 = vcmp.eq.s32.totalorder %v5012_v19, %v5863_v58  ;;  %vm1708_vm9 = vcmp.eq.s32.totalorder %v5015_v20, %v5863_v58 }
  0xda   : > { %vm6024_vm12 = vmpackc.low %vm1708_vm9, %vm1707_vm8 }
  0xdb   : > { %4243 = vmatpush3.bf16.msk.msra.mxu0 %vm3574_vm14, %v4732_v14  ;;  %vm1861_vm14 = vcmp.eq.s32.totalorder %v4950_v12, %v5875_v59 }
  0xdc   : > { %4267 = vmatpush3.bf16.msk.msra.mxu1 %vm5886_vm15, %v4732_v14  ;;  %4276 = vmatprep.subr.msk.bf16.mxu0 %vm5908_vm4, %v4732_v14  ;;  %vm1862_vm15 = vcmp.eq.s32.totalorder %v4953_v13, %v5875_v59 }
  0xdd   : > { %4300 = vmatprep.subr.msk.bf16.mxu1 %vm5912_vm5, %v4732_v14  ;;  %vm5969_vm1 = vmpackc.low %vm1862_vm15, %vm1861_vm14  ;;  %vm1705_vm14 = vcmp.eq.s32.totalorder %v5042_v23, %v5863_v58  ;;  %vm1706_vm15 = vcmp.eq.s32.totalorder %v5045_v24, %v5863_v58 }
  0xde   : > { %4245 = vmatmul.mubr.bf16.vlgmr.msra.gmra.mxu0 %v5195_v40  ;;  %vm3634_vm2 = vmpackc.low %vm1706_vm15, %vm1705_vm14 }
  0xdf   : > { %4269 = vmatmul.mubr.bf16.vlgmr.msra.gmra.mxu1 %v5195_v40  ;;  %4277 = vmatpush3.bf16.msk.msra.mxu0 %vm5908_vm4, %v4732_v14  ;;  %vm1859_vm4 = vcmp.eq.s32.totalorder %v4979_v15, %v5875_v59 }
  0xe0   : > { %4301 = vmatpush3.bf16.msk.msra.mxu1 %vm5912_vm5, %v4732_v14  ;;  %4278 = vmatprep.subr.msk.bf16.mxu0 %vm5934_vm10, %v4732_v14  ;;  %vm1860_vm5 = vcmp.eq.s32.totalorder %v4982_v16, %v5875_v59 }
  0xe1   : > { %4302 = vmatprep.subr.msk.bf16.mxu1 %vm5939_vm11, %v4732_v14  ;;  %4248 = vmatprep.mubr.bf16.mxu0 %v5224_v43  ;;  %vm5999_vm7 = vmpackc.low %vm1860_vm5, %vm1859_vm4  ;;  %vm1703_vm4 = vcmp.eq.s32.totalorder %v5076_v27, %v5863_v58  ;;  %vm1704_vm5 = vcmp.eq.s32.totalorder %v5079_v28, %v5863_v58 }
  0xe2   : > { %4272 = vmatprep.mubr.bf16.mxu1 %v5224_v43  ;;  %vm6076_vm8 = vmpackc.low %vm1704_vm5, %vm1703_vm4 }
  0xe3   : > { %4279 = vmatpush3.bf16.msk.msra.mxu0 %vm5934_vm10, %v4732_v14  ;;  %vm1857_vm10 = vcmp.eq.s32.totalorder %v5012_v19, %v5875_v59 }
  0xe4   : > { %4303 = vmatpush3.bf16.msk.msra.mxu1 %vm5939_vm11, %v4732_v14  ;;  %4280 = vmatprep.subr.msk.bf16.mxu0 %vm5965_vm0, %v4732_v14  ;;  %vm1858_vm11 = vcmp.eq.s32.totalorder %v5015_v20, %v5875_v59 }
  0xe5   : > { %4304 = vmatprep.subr.msk.bf16.mxu1 %vm5969_vm1, %v4732_v14  ;;  %vm6029_vm13 = vmpackc.low %vm1858_vm11, %vm1857_vm10  ;;  %vm1701_vm10 = vcmp.eq.s32.totalorder %v4917_v1, %v5863_v58  ;;  %vm1702_vm11 = vcmp.eq.s32.totalorder %v5110_v31, %v5863_v58 }
  0xe6   : > { %4249 = vmatmul.mubr.bf16.gmra.mxu0 %v5267_v47  ;;  %vm3638_vm14 = vmpackc.low %vm1702_vm11, %vm1701_vm10 }
  0xe7   : > { %4281 = vmatpush3.bf16.msk.msra.mxu0 %vm5965_vm0, %v4732_v14  ;;  %4273 = vmatmul.mubr.bf16.gmra.mxu1 %v5267_v47  ;;  %vm1855_vm0 = vcmp.eq.s32.totalorder %v5042_v23, %v5875_v59 }
  0xe8   : > { %4305 = vmatpush3.bf16.msk.msra.mxu1 %vm5969_vm1, %v4732_v14  ;;  %4282 = vmatprep.subr.msk.bf16.mxu0 %vm5994_vm6, %v4732_v14  ;;  %vm1856_vm1 = vcmp.eq.s32.totalorder %v5045_v24, %v5875_v59 }
  0xe9   : > { %4306 = vmatprep.subr.msk.bf16.mxu1 %vm5999_vm7, %v4732_v14  ;;  %4292 = vmatprep.mubr.bf16.mxu0 %v4937_v9  ;;  %vm6054_vm3 = vmpackc.low %vm1856_vm1, %vm1855_vm0  ;;  %vm2015_vm0 = vcmp.eq.s32.totalorder %v4922_v4, %v6091_v25  ;;  %vm2016_vm1 = vcmp.eq.s32.totalorder %v4925_v5, %v6091_v25 }
  0xea   : > { %4316 = vmatprep.mubr.bf16.mxu1 %v4937_v9  ;;  %vm6134_vm4 = vmpackc.low %vm2016_vm1, %vm2015_vm0 }
  0xeb   : > { %4283 = vmatpush3.bf16.msk.msra.mxu0 %vm5994_vm6, %v4732_v14  ;;  %vm1853_vm6 = vcmp.eq.s32.totalorder %v5076_v27, %v5875_v59 }
  0xec   : > { %4307 = vmatpush3.bf16.msk.msra.mxu1 %vm5999_vm7, %v4732_v14  ;;  %4284 = vmatprep.subr.msk.bf16.mxu0 %vm6024_vm12, %v4732_v14  ;;  %vm1854_vm7 = vcmp.eq.s32.totalorder %v5079_v28, %v5875_v59 }
  0xed   : > { %4308 = vmatprep.subr.msk.bf16.mxu1 %vm6029_vm13, %v4732_v14  ;;  %vm6080_vm9 = vmpackc.low %vm1854_vm7, %vm1853_vm6  ;;  %vm2013_vm6 = vcmp.eq.s32.totalorder %v4931_v7, %v6091_v25  ;;  %vm2014_vm7 = vcmp.eq.s32.totalorder %v4934_v8, %v6091_v25 }
  0xee   : > { %vm6160_vm10 = vmpackc.low %vm2014_vm7, %vm2013_vm6 }
  0xef   : > { %4285 = vmatpush3.bf16.msk.msra.mxu0 %vm6024_vm12, %v4732_v14  ;;  %vm1851_vm12 = vcmp.eq.s32.totalorder %v4917_v1, %v5875_v59 }
  0xf0   : > { %4309 = vmatpush3.bf16.msk.msra.mxu1 %vm6029_vm13, %v4732_v14  ;;  %4286 = vmatprep.subr.msk.bf16.mxu0 %vm3634_vm2, %v4732_v14  ;;  %vm1852_vm13 = vcmp.eq.s32.totalorder %v5110_v31, %v5875_v59 }
  0xf1   : > { %4310 = vmatprep.subr.msk.bf16.mxu1 %vm6054_vm3, %v4732_v14  ;;  %vm6112_vm15 = vmpackc.low %vm1852_vm13, %vm1851_vm12  ;;  %vm2011_vm12 = vcmp.eq.s32.totalorder %v4950_v12, %v6091_v25  ;;  %vm2012_vm13 = vcmp.eq.s32.totalorder %v4953_v13, %v6091_v25 }
  0xf2   : > { %vm6191_vm0 = vmpackc.low %vm2012_vm13, %vm2011_vm12 }
  0xf3   : > { %4287 = vmatpush3.bf16.msk.msra.mxu0 %vm3634_vm2, %v4732_v14  ;;  %vm2165_vm2 = vcmp.eq.s32.totalorder %v4922_v4, %v6101_v26 }
  0xf4   : > { %4311 = vmatpush3.bf16.msk.msra.mxu1 %vm6054_vm3, %v4732_v14  ;;  %4288 = vmatprep.subr.msk.bf16.mxu0 %vm6076_vm8, %v4732_v14  ;;  %vm2166_vm3 = vcmp.eq.s32.totalorder %v4925_v5, %v6101_v26 }
  0xf5   : > { %4312 = vmatprep.subr.msk.bf16.mxu1 %vm6080_vm9, %v4732_v14  ;;  %vm6138_vm5 = vmpackc.low %vm2166_vm3, %vm2165_vm2  ;;  %vm2009_vm2 = vcmp.eq.s32.totalorder %v4979_v15, %v6091_v25  ;;  %vm2010_vm3 = vcmp.eq.s32.totalorder %v4982_v16, %v6091_v25 }
  0xf6   : > { %vm6220_vm6 = vmpackc.low %vm2010_vm3, %vm2009_vm2 }
  0xf7   : > { %4289 = vmatpush3.bf16.msk.msra.mxu0 %vm6076_vm8, %v4732_v14  ;;  %vm2163_vm8 = vcmp.eq.s32.totalorder %v4931_v7, %v6101_v26 }
  0xf8   : > { %4313 = vmatpush3.bf16.msk.msra.mxu1 %vm6080_vm9, %v4732_v14  ;;  %4290 = vmatprep.subr.msk.bf16.mxu0 %vm3638_vm14, %v4732_v14  ;;  %vm2164_vm9 = vcmp.eq.s32.totalorder %v4934_v8, %v6101_v26 }
  0xf9   : > { %4314 = vmatprep.subr.msk.bf16.mxu1 %vm6112_vm15, %v4732_v14  ;;  %vm6165_vm11 = vmpackc.low %vm2164_vm9, %vm2163_vm8  ;;  %vm2007_vm8 = vcmp.eq.s32.totalorder %v5012_v19, %v6091_v25  ;;  %vm2008_vm9 = vcmp.eq.s32.totalorder %v5015_v20, %v6091_v25 }
  0xfa   : > { %vm6250_vm12 = vmpackc.low %vm2008_vm9, %vm2007_vm8 }
  0xfb   : > { %4291 = vmatpush3.bf16.msk.msra.mxu0 %vm3638_vm14, %v4732_v14  ;;  %vm2161_vm14 = vcmp.eq.s32.totalorder %v4950_v12, %v6101_v26 }
  0xfc   : > { %4315 = vmatpush3.bf16.msk.msra.mxu1 %vm6112_vm15, %v4732_v14  ;;  %4324 = vmatprep.subr.msk.bf16.mxu0 %vm6134_vm4, %v4732_v14  ;;  %vm2162_vm15 = vcmp.eq.s32.totalorder %v4953_v13, %v6101_v26 }
  0xfd   : > { %4348 = vmatprep.subr.msk.bf16.mxu1 %vm6138_vm5, %v4732_v14  ;;  %vm6195_vm1 = vmpackc.low %vm2162_vm15, %vm2161_vm14  ;;  %vm2005_vm14 = vcmp.eq.s32.totalorder %v5042_v23, %v6091_v25  ;;  %vm2006_vm15 = vcmp.eq.s32.totalorder %v5045_v24, %v6091_v25 }
  0xfe   : > { %4293 = vmatmul.mubr.bf16.vlgmr.msra.gmra.mxu0 %v5195_v40  ;;  %vm3698_vm2 = vmpackc.low %vm2006_vm15, %vm2005_vm14 }
  0xff   : > { %4317 = vmatmul.mubr.bf16.vlgmr.msra.gmra.mxu1 %v5195_v40  ;;  %4325 = vmatpush3.bf16.msk.msra.mxu0 %vm6134_vm4, %v4732_v14  ;;  %vm2159_vm4 = vcmp.eq.s32.totalorder %v4979_v15, %v6101_v26 }
 0x100   : > { %4349 = vmatpush3.bf16.msk.msra.mxu1 %vm6138_vm5, %v4732_v14  ;;  %4326 = vmatprep.subr.msk.bf16.mxu0 %vm6160_vm10, %v4732_v14  ;;  %vm2160_vm5 = vcmp.eq.s32.totalorder %v4982_v16, %v6101_v26 }
 0x101   : > { %4350 = vmatprep.subr.msk.bf16.mxu1 %vm6165_vm11, %v4732_v14  ;;  %4296 = vmatprep.mubr.bf16.mxu0 %v5224_v43  ;;  %vm6225_vm7 = vmpackc.low %vm2160_vm5, %vm2159_vm4  ;;  %vm2003_vm4 = vcmp.eq.s32.totalorder %v5076_v27, %v6091_v25  ;;  %vm2004_vm5 = vcmp.eq.s32.totalorder %v5079_v28, %v6091_v25 }
 0x102   : > { %4320 = vmatprep.mubr.bf16.mxu1 %v5224_v43  ;;  %vm6305_vm8 = vmpackc.low %vm2004_vm5, %vm2003_vm4 }
 0x103   : > { %4327 = vmatpush3.bf16.msk.msra.mxu0 %vm6160_vm10, %v4732_v14  ;;  %vm2157_vm10 = vcmp.eq.s32.totalorder %v5012_v19, %v6101_v26 }
 0x104   : > { %4351 = vmatpush3.bf16.msk.msra.mxu1 %vm6165_vm11, %v4732_v14  ;;  %4328 = vmatprep.subr.msk.bf16.mxu0 %vm6191_vm0, %v4732_v14  ;;  %vm2158_vm11 = vcmp.eq.s32.totalorder %v5015_v20, %v6101_v26 }
 0x105   : > { %4352 = vmatprep.subr.msk.bf16.mxu1 %vm6195_vm1, %v4732_v14  ;;  %vm6258_vm13 = vmpackc.low %vm2158_vm11, %vm2157_vm10  ;;  %vm2001_vm10 = vcmp.eq.s32.totalorder %v4917_v1, %v6091_v25  ;;  %vm2002_vm11 = vcmp.eq.s32.totalorder %v5110_v31, %v6091_v25 }
 0x106   : > { %4297 = vmatmul.mubr.bf16.gmra.mxu0 %v5267_v47  ;;  %vm3702_vm14 = vmpackc.low %vm2002_vm11, %vm2001_vm10 }
 0x107   : > { %4329 = vmatpush3.bf16.msk.msra.mxu0 %vm6191_vm0, %v4732_v14  ;;  %4321 = vmatmul.mubr.bf16.gmra.mxu1 %v5267_v47  ;;  %vm2155_vm0 = vcmp.eq.s32.totalorder %v5042_v23, %v6101_v26 }
 0x108   : > { %4353 = vmatpush3.bf16.msk.msra.mxu1 %vm6195_vm1, %v4732_v14  ;;  %4330 = vmatprep.subr.msk.bf16.mxu0 %vm6220_vm6, %v4732_v14  ;;  %vm2156_vm1 = vcmp.eq.s32.totalorder %v5045_v24, %v6101_v26 }
 0x109   : > { %4354 = vmatprep.subr.msk.bf16.mxu1 %vm6225_vm7, %v4732_v14  ;;  %4340 = vmatprep.mubr.bf16.mxu0 %v6255_v42  ;;  %vm6283_vm3 = vmpackc.low %vm2156_vm1, %vm2155_vm0  ;;  %vm2315_vm0 = vcmp.eq.s32.totalorder %v4922_v4, %v6320_v49  ;;  %vm2316_vm1 = vcmp.eq.s32.totalorder %v4925_v5, %v6320_v49 }
 0x10a   : > { %4364 = vmatprep.mubr.bf16.mxu1 %v6255_v42  ;;  %vm6363_vm4 = vmpackc.low %vm2316_vm1, %vm2315_vm0 }
 0x10b   : > { %4331 = vmatpush3.bf16.msk.msra.mxu0 %vm6220_vm6, %v4732_v14  ;;  %vm2153_vm6 = vcmp.eq.s32.totalorder %v5076_v27, %v6101_v26 }
 0x10c   : > { %4355 = vmatpush3.bf16.msk.msra.mxu1 %vm6225_vm7, %v4732_v14  ;;  %4332 = vmatprep.subr.msk.bf16.mxu0 %vm6250_vm12, %v4732_v14  ;;  %vm2154_vm7 = vcmp.eq.s32.totalorder %v5079_v28, %v6101_v26 }
 0x10d   : > { %4356 = vmatprep.subr.msk.bf16.mxu1 %vm6258_vm13, %v4732_v14  ;;  %vm6309_vm9 = vmpackc.low %vm2154_vm7, %vm2153_vm6  ;;  %vm2313_vm6 = vcmp.eq.s32.totalorder %v4931_v7, %v6320_v49  ;;  %vm2314_vm7 = vcmp.eq.s32.totalorder %v4934_v8, %v6320_v49 }
 0x10e   : > { %vm6389_vm10 = vmpackc.low %vm2314_vm7, %vm2313_vm6 }
 0x10f   : > { %4333 = vmatpush3.bf16.msk.msra.mxu0 %vm6250_vm12, %v4732_v14  ;;  %vm2151_vm12 = vcmp.eq.s32.totalorder %v4917_v1, %v6101_v26 }
 0x110   : > { %4357 = vmatpush3.bf16.msk.msra.mxu1 %vm6258_vm13, %v4732_v14  ;;  %4334 = vmatprep.subr.msk.bf16.mxu0 %vm3698_vm2, %v4732_v14  ;;  %vm2152_vm13 = vcmp.eq.s32.totalorder %v5110_v31, %v6101_v26 }
 0x111   : > { %4358 = vmatprep.subr.msk.bf16.mxu1 %vm6283_vm3, %v4732_v14  ;;  %vm6341_vm15 = vmpackc.low %vm2152_vm13, %vm2151_vm12  ;;  %vm2311_vm12 = vcmp.eq.s32.totalorder %v4950_v12, %v6320_v49  ;;  %vm2312_vm13 = vcmp.eq.s32.totalorder %v4953_v13, %v6320_v49 }
 0x112   : > { %vm6420_vm0 = vmpackc.low %vm2312_vm13, %vm2311_vm12 }
 0x113   : > { %4335 = vmatpush3.bf16.msk.msra.mxu0 %vm3698_vm2, %v4732_v14  ;;  %vm2465_vm2 = vcmp.eq.s32.totalorder %v4922_v4, %v6330_v50 }
 0x114   : > { %4359 = vmatpush3.bf16.msk.msra.mxu1 %vm6283_vm3, %v4732_v14  ;;  %4336 = vmatprep.subr.msk.bf16.mxu0 %vm6305_vm8, %v4732_v14  ;;  %vm2466_vm3 = vcmp.eq.s32.totalorder %v4925_v5, %v6330_v50 }
 0x115   : > { %4360 = vmatprep.subr.msk.bf16.mxu1 %vm6309_vm9, %v4732_v14  ;;  %vm6367_vm5 = vmpackc.low %vm2466_vm3, %vm2465_vm2  ;;  %vm2309_vm2 = vcmp.eq.s32.totalorder %v4979_v15, %v6320_v49  ;;  %vm2310_vm3 = vcmp.eq.s32.totalorder %v4982_v16, %v6320_v49 }
 0x116   : > { %vm6449_vm6 = vmpackc.low %vm2310_vm3, %vm2309_vm2 }
 0x117   : > { %4337 = vmatpush3.bf16.msk.msra.mxu0 %vm6305_vm8, %v4732_v14  ;;  %vm2463_vm8 = vcmp.eq.s32.totalorder %v4931_v7, %v6330_v50 }
 0x118   : > { %4361 = vmatpush3.bf16.msk.msra.mxu1 %vm6309_vm9, %v4732_v14  ;;  %4338 = vmatprep.subr.msk.bf16.mxu0 %vm3702_vm14, %v4732_v14  ;;  %vm2464_vm9 = vcmp.eq.s32.totalorder %v4934_v8, %v6330_v50 }
 0x119   : > { %4362 = vmatprep.subr.msk.bf16.mxu1 %vm6341_vm15, %v4732_v14  ;;  %vm6394_vm11 = vmpackc.low %vm2464_vm9, %vm2463_vm8  ;;  %vm2307_vm8 = vcmp.eq.s32.totalorder %v5012_v19, %v6320_v49  ;;  %vm2308_vm9 = vcmp.eq.s32.totalorder %v5015_v20, %v6320_v49 }
 0x11a   : > { %vm6479_vm12 = vmpackc.low %vm2308_vm9, %vm2307_vm8 }
 0x11b   : > { %4339 = vmatpush3.bf16.msk.msra.mxu0 %vm3702_vm14, %v4732_v14  ;;  %vm2461_vm14 = vcmp.eq.s32.totalorder %v4950_v12, %v6330_v50 }
 0x11c   : > { %4363 = vmatpush3.bf16.msk.msra.mxu1 %vm6341_vm15, %v4732_v14  ;;  %4372 = vmatprep.subr.msk.bf16.mxu0 %vm6363_vm4, %v4732_v14  ;;  %vm2462_vm15 = vcmp.eq.s32.totalorder %v4953_v13, %v6330_v50 }
 0x11d   : > { %4396 = vmatprep.subr.msk.bf16.mxu1 %vm6367_vm5, %v4732_v14  ;;  %vm6424_vm1 = vmpackc.low %vm2462_vm15, %vm2461_vm14  ;;  %vm2305_vm14 = vcmp.eq.s32.totalorder %v5042_v23, %v6320_v49  ;;  %vm2306_vm15 = vcmp.eq.s32.totalorder %v5045_v24, %v6320_v49 }
 0x11e   : > { %4341 = vmatmul.mubr.bf16.vlgmr.msra.gmra.mxu0 %v5195_v40  ;;  %vm3762_vm2 = vmpackc.low %vm2306_vm15, %vm2305_vm14 }
 0x11f   : > { %4365 = vmatmul.mubr.bf16.vlgmr.msra.gmra.mxu1 %v5195_v40  ;;  %4373 = vmatpush3.bf16.msk.msra.mxu0 %vm6363_vm4, %v4732_v14  ;;  %vm2459_vm4 = vcmp.eq.s32.totalorder %v4979_v15, %v6330_v50 }
 0x120   : > { %4397 = vmatpush3.bf16.msk.msra.mxu1 %vm6367_vm5, %v4732_v14  ;;  %4374 = vmatprep.subr.msk.bf16.mxu0 %vm6389_vm10, %v4732_v14  ;;  %vm2460_vm5 = vcmp.eq.s32.totalorder %v4982_v16, %v6330_v50 }
 0x121   : > { %4398 = vmatprep.subr.msk.bf16.mxu1 %vm6394_vm11, %v4732_v14  ;;  %4344 = vmatprep.mubr.bf16.mxu0 %v5224_v43  ;;  %vm6454_vm7 = vmpackc.low %vm2460_vm5, %vm2459_vm4  ;;  %vm2303_vm4 = vcmp.eq.s32.totalorder %v5076_v27, %v6320_v49  ;;  %vm2304_vm5 = vcmp.eq.s32.totalorder %v5079_v28, %v6320_v49 }
 0x122   : > { %4368 = vmatprep.mubr.bf16.mxu1 %v5224_v43  ;;  %vm6531_vm8 = vmpackc.low %vm2304_vm5, %vm2303_vm4 }
 0x123   : > { %4375 = vmatpush3.bf16.msk.msra.mxu0 %vm6389_vm10, %v4732_v14  ;;  %vm2457_vm10 = vcmp.eq.s32.totalorder %v5012_v19, %v6330_v50 }
 0x124   : > { %4399 = vmatpush3.bf16.msk.msra.mxu1 %vm6394_vm11, %v4732_v14  ;;  %4376 = vmatprep.subr.msk.bf16.mxu0 %vm6420_vm0, %v4732_v14  ;;  %vm2458_vm11 = vcmp.eq.s32.totalorder %v5015_v20, %v6330_v50 }
 0x125   : > { %4400 = vmatprep.subr.msk.bf16.mxu1 %vm6424_vm1, %v4732_v14  ;;  %vm6484_vm13 = vmpackc.low %vm2458_vm11, %vm2457_vm10  ;;  %vm2301_vm10 = vcmp.eq.s32.totalorder %v4917_v1, %v6320_v49  ;;  %vm2302_vm11 = vcmp.eq.s32.totalorder %v5110_v31, %v6320_v49 }
 0x126   : > { %4345 = vmatmul.mubr.bf16.gmra.mxu0 %v5267_v47  ;;  %vm3766_vm14 = vmpackc.low %vm2302_vm11, %vm2301_vm10 }
 0x127   : > { %4377 = vmatpush3.bf16.msk.msra.mxu0 %vm6420_vm0, %v4732_v14  ;;  %4369 = vmatmul.mubr.bf16.gmra.mxu1 %v5267_v47  ;;  %vm2455_vm0 = vcmp.eq.s32.totalorder %v5042_v23, %v6330_v50 }
 0x128   : > { %4401 = vmatpush3.bf16.msk.msra.mxu1 %vm6424_vm1, %v4732_v14  ;;  %4378 = vmatprep.subr.msk.bf16.mxu0 %vm6449_vm6, %v4732_v14  ;;  %vm2456_vm1 = vcmp.eq.s32.totalorder %v5045_v24, %v6330_v50 }
 0x129   : > { %4402 = vmatprep.subr.msk.bf16.mxu1 %vm6454_vm7, %v4732_v14  ;;  %4388 = vmatprep.mubr.bf16.mxu0 %v6255_v42  ;;  %vm6509_vm3 = vmpackc.low %vm2456_vm1, %vm2455_vm0  ;;  %vm2615_vm0 = vcmp.eq.s32.totalorder %v4922_v4, %v6546_v61  ;;  %vm2616_vm1 = vcmp.eq.s32.totalorder %v4925_v5, %v6546_v61 }
 0x12a   : > { %4412 = vmatprep.mubr.bf16.mxu1 %v6255_v42  ;;  %vm6589_vm4 = vmpackc.low %vm2616_vm1, %vm2615_vm0 }
 0x12b   : > { %4379 = vmatpush3.bf16.msk.msra.mxu0 %vm6449_vm6, %v4732_v14  ;;  %vm2453_vm6 = vcmp.eq.s32.totalorder %v5076_v27, %v6330_v50 }
 0x12c   : > { %4403 = vmatpush3.bf16.msk.msra.mxu1 %vm6454_vm7, %v4732_v14  ;;  %4380 = vmatprep.subr.msk.bf16.mxu0 %vm6479_vm12, %v4732_v14  ;;  %vm2454_vm7 = vcmp.eq.s32.totalorder %v5079_v28, %v6330_v50 }
 0x12d   : > { %4404 = vmatprep.subr.msk.bf16.mxu1 %vm6484_vm13, %v4732_v14  ;;  %vm6535_vm9 = vmpackc.low %vm2454_vm7, %vm2453_vm6  ;;  %vm2613_vm6 = vcmp.eq.s32.totalorder %v4931_v7, %v6546_v61  ;;  %vm2614_vm7 = vcmp.eq.s32.totalorder %v4934_v8, %v6546_v61 }
 0x12e   : > { %vm6615_vm10 = vmpackc.low %vm2614_vm7, %vm2613_vm6 }
 0x12f   : > { %4381 = vmatpush3.bf16.msk.msra.mxu0 %vm6479_vm12, %v4732_v14  ;;  %vm2451_vm12 = vcmp.eq.s32.totalorder %v4917_v1, %v6330_v50 }
 0x130   : > { %4405 = vmatpush3.bf16.msk.msra.mxu1 %vm6484_vm13, %v4732_v14  ;;  %4382 = vmatprep.subr.msk.bf16.mxu0 %vm3762_vm2, %v4732_v14  ;;  %vm2452_vm13 = vcmp.eq.s32.totalorder %v5110_v31, %v6330_v50 }
 0x131   : > { %4406 = vmatprep.subr.msk.bf16.mxu1 %vm6509_vm3, %v4732_v14  ;;  %vm6567_vm15 = vmpackc.low %vm2452_vm13, %vm2451_vm12  ;;  %vm2611_vm12 = vcmp.eq.s32.totalorder %v4950_v12, %v6546_v61  ;;  %vm2612_vm13 = vcmp.eq.s32.totalorder %v4953_v13, %v6546_v61 }
 0x132   : > { %vm6665_vm0 = vmpackc.low %vm2612_vm13, %vm2611_vm12 }
 0x133   : > { %4383 = vmatpush3.bf16.msk.msra.mxu0 %vm3762_vm2, %v4732_v14  ;;  %vm2765_vm2 = vcmp.eq.s32.totalorder %v4922_v4, %v6556_v62 }
 0x134   : > { %4407 = vmatpush3.bf16.msk.msra.mxu1 %vm6509_vm3, %v4732_v14  ;;  %4384 = vmatprep.subr.msk.bf16.mxu0 %vm6531_vm8, %v4732_v14  ;;  %vm2766_vm3 = vcmp.eq.s32.totalorder %v4925_v5, %v6556_v62 }
 0x135   : > { %4408 = vmatprep.subr.msk.bf16.mxu1 %vm6535_vm9, %v4732_v14  ;;  %vm6593_vm5 = vmpackc.low %vm2766_vm3, %vm2765_vm2  ;;  %vm2609_vm2 = vcmp.eq.s32.totalorder %v4979_v15, %v6546_v61  ;;  %vm2610_vm3 = vcmp.eq.s32.totalorder %v4982_v16, %v6546_v61 }
 0x136   : > { %vm6706_vm6 = vmpackc.low %vm2610_vm3, %vm2609_vm2 }
 0x137   : > { %4385 = vmatpush3.bf16.msk.msra.mxu0 %vm6531_vm8, %v4732_v14  ;;  %vm2763_vm8 = vcmp.eq.s32.totalorder %v4931_v7, %v6556_v62 }
 0x138   : > { %4409 = vmatpush3.bf16.msk.msra.mxu1 %vm6535_vm9, %v4732_v14  ;;  %4386 = vmatprep.subr.msk.bf16.mxu0 %vm3766_vm14, %v4732_v14  ;;  %vm2764_vm9 = vcmp.eq.s32.totalorder %v4934_v8, %v6556_v62 }
 0x139   : > { %4410 = vmatprep.subr.msk.bf16.mxu1 %vm6567_vm15, %v4732_v14  ;;  %vm6625_vm11 = vmpackc.low %vm2764_vm9, %vm2763_vm8  ;;  %vm2607_vm8 = vcmp.eq.s32.totalorder %v5012_v19, %v6546_v61  ;;  %vm2608_vm9 = vcmp.eq.s32.totalorder %v5015_v20, %v6546_v61 }
 0x13a   : > { %vm6749_vm12 = vmpackc.low %vm2608_vm9, %vm2607_vm8 }
 0x13b   : > { %4387 = vmatpush3.bf16.msk.msra.mxu0 %vm3766_vm14, %v4732_v14  ;;  %vm2761_vm14 = vcmp.eq.s32.totalorder %v4950_v12, %v6556_v62 }
 0x13c   : > { %4411 = vmatpush3.bf16.msk.msra.mxu1 %vm6567_vm15, %v4732_v14  ;;  %4420 = vmatprep.subr.msk.bf16.mxu0 %vm6589_vm4, %v4732_v14  ;;  %vm2762_vm15 = vcmp.eq.s32.totalorder %v4953_v13, %v6556_v62  ;;  %v6659_v13 = vld [vmem:[%s4911_s22 + $0x10] sm:$0xff]  }
 0x13d   : > { %4444 = vmatprep.subr.msk.bf16.mxu1 %vm6593_vm5, %v4732_v14  ;;  %vm6673_vm1 = vmpackc.low %vm2762_vm15, %vm2761_vm14  ;;  %vm2605_vm14 = vcmp.eq.s32.totalorder %v5042_v23, %v6546_v61  ;;  %vm2606_vm15 = vcmp.eq.s32.totalorder %v5045_v24, %v6546_v61 }
 0x13e   : > { %v6619_v7 = vpop.f32.mrf.mxu0  ;;  %4389 = vmatmul.mubr.bf16.vlgmr.msra.gmra.mxu0 %v6622_v53  ;;  %vm6791_vm2 = vmpackc.low %vm2606_vm15, %vm2605_vm14 }
 0x13f   : > { %v6633_v63 = vpop.f32.mrf.mxu1  ;;  %4413 = vmatmul.mubr.bf16.vlgmr.msra.gmra.mxu1 %v6622_v53  ;;  %4421 = vmatpush3.bf16.msk.msra.mxu0 %vm6589_vm4, %v4732_v14  ;;  %vm2759_vm4 = vcmp.eq.s32.totalorder %v4979_v15, %v6556_v62 }
 0x140   : > { %v2918_v0 = vmax.f32 %v6619_v7, %v6633_v63  ;;  %4445 = vmatpush3.bf16.msk.msra.mxu1 %vm6593_vm5, %v4732_v14  ;;  %v6648_v10 = vpop.f32.mrf.mxu0  ;;  %4422 = vmatprep.subr.msk.bf16.mxu0 %vm6615_vm10, %v4732_v14  ;;  %vm2760_vm5 = vcmp.eq.s32.totalorder %v4982_v16, %v6556_v62 }
 0x141   : > { %v6653_v11 = vpop.f32.mrf.mxu1  ;;  %4446 = vmatprep.subr.msk.bf16.mxu1 %vm6625_vm11, %v4732_v14  ;;  %4392 = vmatprep.mubr.bf16.mxu0 %v6659_v13  ;;  %vm6716_vm7 = vmpackc.low %vm2760_vm5, %vm2759_vm4  ;;  %vm2603_vm4 = vcmp.eq.s32.totalorder %v5076_v27, %v6546_v61  ;;  %vm2604_vm5 = vcmp.eq.s32.totalorder %v5079_v28, %v6546_v61 }
 0x142   : > { %v2916_v18 = vmax.f32 %v6648_v10, %v6653_v11  ;;  %v6671_v9 = vpop.f32.mrf.mxu0  ;;  %4416 = vmatprep.mubr.bf16.mxu1 %v6659_v13  ;;  %vm3828_vm8 = vmpackc.low %vm2604_vm5, %vm2603_vm4 }
 0x143   : > { %v6682_v12 = vpop.f32.mrf.mxu1  ;;  %4423 = vmatpush3.bf16.msk.msra.mxu0 %vm6615_vm10, %v4732_v14  ;;  %vm2757_vm10 = vcmp.eq.s32.totalorder %v5012_v19, %v6556_v62 }
 0x144   : > { %v2919_v22 = vmax.f32 %v6671_v9, %v6682_v12  ;;  %4447 = vmatpush3.bf16.msk.msra.mxu1 %vm6625_vm11, %v4732_v14  ;;  %v6696_v25 = vpop.f32.mrf.mxu0  ;;  %4424 = vmatprep.subr.msk.bf16.mxu0 %vm6665_vm0, %v4732_v14  ;;  %vm2758_vm11 = vcmp.eq.s32.totalorder %v5015_v20, %v6556_v62 }
 0x145   : > { %v6701_v26 = vpop.f32.mrf.mxu1  ;;  %4448 = vmatprep.subr.msk.bf16.mxu1 %vm6673_vm1, %v4732_v14  ;;  %vm6756_vm13 = vmpackc.low %vm2758_vm11, %vm2757_vm10  ;;  %vm2601_vm10 = vcmp.eq.s32.totalorder %v4917_v1, %v6546_v61  ;;  %vm2602_vm11 = vcmp.eq.s32.totalorder %v5110_v31, %v6546_v61 }
 0x146   : > { %v2917_v16 = vmax.f32 %v6696_v25, %v6701_v26  ;;  %4393 = vmatmul.mubr.bf16.gmra.mxu0 %v6713_v32  ;;  %v6724_v34 = vpop.f32.mrf.mxu0  ;;  %vm3830_vm14 = vmpackc.low %vm2602_vm11, %vm2601_vm10 }
 0x147   : > { %4425 = vmatpush3.bf16.msk.msra.mxu0 %vm6665_vm0, %v4732_v14  ;;  %4417 = vmatmul.mubr.bf16.gmra.mxu1 %v6713_v32  ;;  %v6734_v35 = vpop.f32.mrf.mxu1  ;;  %vm2755_vm0 = vcmp.eq.s32.totalorder %v5042_v23, %v6556_v62 }
 0x148   : > { %4449 = vmatpush3.bf16.msk.msra.mxu1 %vm6673_vm1, %v4732_v14  ;;  %4426 = vmatprep.subr.msk.bf16.mxu0 %vm6706_vm6, %v4732_v14  ;;  %v2922_v36 = vmax.f32 %v6724_v34, %v6734_v35  ;;  %v6744_v37 = vpop.f32.mrf.mxu0  ;;  %vm2756_vm1 = vcmp.eq.s32.totalorder %v5045_v24, %v6556_v62 }
 0x149   : > { %4450 = vmatprep.subr.msk.bf16.mxu1 %vm6716_vm7, %v4732_v14  ;;  %v6753_v20 = vpop.f32.mrf.mxu1  ;;  %4436 = vmatprep.mubr.bf16.mxu0 %v6255_v42  ;;  %vm6797_vm3 = vmpackc.low %vm2756_vm1, %vm2755_vm0 }
 0x14a   : > { %v2920_v6 = vmax.f32 %v6744_v37, %v6753_v20  ;;  %v6766_v39 = vpop.f32.mrf.mxu0  ;;  %4460 = vmatprep.mubr.bf16.mxu1 %v6255_v42 }
 0x14b   : > { %4427 = vmatpush3.bf16.msk.msra.mxu0 %vm6706_vm6, %v4732_v14  ;;  %v6776_v41 = vpop.f32.mrf.mxu1  ;;  %vm2753_vm6 = vcmp.eq.s32.totalorder %v5076_v27, %v6556_v62 }
 0x14c   : > { %4451 = vmatpush3.bf16.msk.msra.mxu1 %vm6716_vm7, %v4732_v14  ;;  %4428 = vmatprep.subr.msk.bf16.mxu0 %vm6749_vm12, %v4732_v14  ;;  %v2923_v42 = vmax.f32 %v6766_v39, %v6776_v41  ;;  %v6786_v44 = vpop.f32.mrf.mxu0  ;;  %vm2754_vm7 = vcmp.eq.s32.totalorder %v5079_v28, %v6556_v62 }
 0x14d   : > { %4452 = vmatprep.subr.msk.bf16.mxu1 %vm6756_vm13, %v4732_v14  ;;  %v6795_v24 = vpop.f32.mrf.mxu1  ;;  %vm3860_vm9 = vmpackc.low %vm2754_vm7, %vm2753_vm6 }
 0x14e   : > { %v2921_v46 = vmax.f32 %v6786_v44, %v6795_v24 }
 0x14f   : > { %4429 = vmatpush3.bf16.msk.msra.mxu0 %vm6749_vm12, %v4732_v14  ;;  %vm2751_vm12 = vcmp.eq.s32.totalorder %v4917_v1, %v6556_v62 }
 0x150   : > { %4453 = vmatpush3.bf16.msk.msra.mxu1 %vm6756_vm13, %v4732_v14  ;;  %4430 = vmatprep.subr.msk.bf16.mxu0 %vm6791_vm2, %v4732_v14  ;;  %vm2752_vm13 = vcmp.eq.s32.totalorder %v5110_v31, %v6556_v62 }
 0x151   : > { %4454 = vmatprep.subr.msk.bf16.mxu1 %vm6797_vm3, %v4732_v14  ;;  %vm3862_vm15 = vmpackc.low %vm2752_vm13, %vm2751_vm12 }
 0x153   : > { %4431 = vmatpush3.bf16.msk.msra.mxu0 %vm6791_vm2, %v4732_v14 }
 0x154   : > { %4455 = vmatpush3.bf16.msk.msra.mxu1 %vm6797_vm3, %v4732_v14  ;;  %4432 = vmatprep.subr.msk.bf16.mxu0 %vm3828_vm8, %v4732_v14 }
 0x155   : > { %4456 = vmatprep.subr.msk.bf16.mxu1 %vm3860_vm9, %v4732_v14 }
 0x157   : > { %4433 = vmatpush3.bf16.msk.msra.mxu0 %vm3828_vm8, %v4732_v14 }
 0x158   : > { %4457 = vmatpush3.bf16.msk.msra.mxu1 %vm3860_vm9, %v4732_v14  ;;  %4434 = vmatprep.subr.msk.bf16.mxu0 %vm3830_vm14, %v4732_v14 }
 0x159   : > { %4458 = vmatprep.subr.msk.bf16.mxu1 %vm3862_vm15, %v4732_v14 }
 0x15b   : > { %4435 = vmatpush3.bf16.msk.msra.mxu0 %vm3830_vm14, %v4732_v14 }
 0x15c   : > { %4459 = vmatpush3.bf16.msk.msra.mxu1 %vm3862_vm15, %v4732_v14 }
 0x15e   : > { %v4150_v1 = vpop.f32.mrf.mxu0  ;;  %4437 = vmatmul.mubr.bf16.vlgmr.msra.gmra.mxu0 %v6622_v53 }
 0x15f   : > { %v6849_v27 = vmax.f32 %v2918_v0, %v4150_v1  ;;  %v6851_v28 = vpop.f32.mrf.mxu1  ;;  %4461 = vmatmul.mubr.bf16.vlgmr.msra.gmra.mxu1 %v6622_v53  ;;  %4440 = vmatprep.mubr.bf16.mxu0 %v6659_v13 }
 0x160   : > { %v900_v31 = vpop.f32.mrf.mxu0  ;;  %4464 = vmatprep.mubr.bf16.mxu1 %v6659_v13 }
 0x161   : > { %v6861_v48 = vmax.f32 %v2916_v18, %v900_v31  ;;  %v6863_v49 = vpop.f32.mrf.mxu1 }
 0x162   : > { %v4151_v50 = vpop.f32.mrf.mxu0 }
 0x163   : > { %v6870_v55 = vmax.f32 %v2919_v22, %v4151_v50  ;;  %v6872_v51 = vpop.f32.mrf.mxu1 }
 0x164   : > { %v903_v52 = vpop.f32.mrf.mxu0 }
 0x165   : > { %v6879_v40 = vmax.f32 %v2917_v16, %v903_v52  ;;  %v6881_v57 = vpop.f32.mrf.mxu1 }
 0x166   : > { %v4154_v43 = vpop.f32.mrf.mxu0  ;;  %4441 = vmatmul.mubr.bf16.gmra.mxu0 %v6713_v32 }
 0x167   : > { %v6889_v47 = vmax.f32 %v2922_v36, %v4154_v43  ;;  %4465 = vmatmul.mubr.bf16.gmra.mxu1 %v6713_v32  ;;  %v6892_v59 = vpop.f32.mrf.mxu1 }
 0x168   : > { %v916_v2 = vpop.f32.mrf.mxu0 }
 0x169   : > { %v6897_v3 = vmax.f32 %v2920_v6, %v916_v2  ;;  %v6901_v61 = vpop.f32.mrf.mxu1 }
 0x16a   : > { %v4155_v62 = vpop.f32.mrf.mxu0 }
 0x16b   : > { %v6906_v29 = vmax.f32 %v2923_v42, %v4155_v62  ;;  %v6910_v4 = vpop.f32.mrf.mxu1 }
 0x16c   : > { %v919_v5 = vpop.f32.mrf.mxu0 }
 0x16d   : > { %v6912_v7 = vmax.f32 %v2921_v46, %v919_v5  ;;  %v6916_v8 = vpop.f32.mrf.mxu1 }
 0x17e   : > { %v6920_v0 = vpop.f32.mrf.mxu0 }
 0x17f   : > { %v6926_v13 = vpop.f32.mrf.mxu1 }
 0x180   : > { %v6922_v10 = vpop.f32.mrf.mxu0 }
 0x181   : > { %v6930_v18 = vpop.f32.mrf.mxu1 }
 0x182   : > { %v6924_v11 = vpop.f32.mrf.mxu0 }
 0x183   : > { %v6934_v21 = vpop.f32.mrf.mxu1 }
 0x184   : > { %v6928_v17 = vpop.f32.mrf.mxu0 }
 0x185   : > { %v6938_v22 = vpop.f32.mrf.mxu1 }
 0x186   : > { %v6932_v9 = vpop.f32.mrf.mxu0 }
 0x187   : > { %v6942_v26 = vpop.f32.mrf.mxu1 }
 0x188   : > { %v6936_v12 = vpop.f32.mrf.mxu0 }
 0x189   : > { %v6946_v16 = vpop.f32.mrf.mxu1 }
 0x18a   : > { %v6940_v25 = vpop.f32.mrf.mxu0 }
 0x18b   : > { %v6948_v33 = vpop.f32.mrf.mxu1 }
 0x18c   : > { %v6944_v15 = vpop.f32.mrf.mxu0 }
 0x18d   : > { %v6950_v35 = vpop.f32.mrf.mxu1 }
 0x19e   : > { %v4246_v32 = vpop.f32.mrf.mxu0 }
 0x19f   : > { %v6954_v37 = vpop.f32.mrf.mxu1 }
 0x1a0   : > { %v1500_v34 = vpop.f32.mrf.mxu0 }
 0x1a1   : > { %v6958_v20 = vpop.f32.mrf.mxu1 }
 0x1a2   : > { %v6952_v36 = vpop.f32.mrf.mxu0 }
 0x1a3   : > { %v6962_v6 = vpop.f32.mrf.mxu1 }
 0x1a4   : > { %v6956_v19 = vpop.f32.mrf.mxu0 }
 0x1a5   : > { %v6966_v41 = vpop.f32.mrf.mxu1 }
 0x1a6   : > { %v6960_v38 = vpop.f32.mrf.mxu0 }
 0x1a7   : > { %v6968_v42 = vpop.f32.mrf.mxu1 }
 0x1a8   : > { %v6964_v39 = vpop.f32.mrf.mxu0 }
 0x1a9   : > { %v6972_v23 = vpop.f32.mrf.mxu1 }
 0x1aa   : > { %v6970_v44 = vpop.f32.mrf.mxu0 }
 0x1ab   : > { %v6976_v46 = vpop.f32.mrf.mxu1 }
 0x1ac   : > { %v6974_v24 = vpop.f32.mrf.mxu0  ;;  %7471 = vst [vmem:[#allocation14_spill] sm:$0xff] %v6976_v46 }
 0x1ad   : > { %v6978_v31 = vpop.f32.mrf.mxu1 }
 0x1ae   : > { %7472 = vst [vmem:[#allocation15_spill] sm:$0xff] %v6978_v31 }
 0x1be   : > { %v4294_v45 = vpop.f32.mrf.mxu0 }
 0x1bf   : > { %v6980_v50 = vpop.f32.mrf.mxu1 }
 0x1c0   : > { %v1800_v1 = vpop.f32.mrf.mxu0 }
 0x1c1   : > { %v6984_v43 = vpop.f32.mrf.mxu1 }
 0x1c2   : > { %v6982_v52 = vpop.f32.mrf.mxu0 }
 0x1c3   : > { %v6988_v62 = vpop.f32.mrf.mxu1 }
 0x1c4   : > { %v6986_v2 = vpop.f32.mrf.mxu0  ;;  %7473 = vst [vmem:[#allocation16_spill] sm:$0xff] %v6988_v62 }
 0x1c5   : > { %v6992_v63 = vpop.f32.mrf.mxu1 }
 0x1c6   : > { %v6990_v5 = vpop.f32.mrf.mxu0  ;;  %7475 = vst [vmem:[#allocation18_spill] sm:$0xff] %v6992_v63 }
 0x1c7   : > { %7474 = vst [vmem:[#allocation17_spill] sm:$0xff] %v6990_v5  ;;  %v6996_v30 = vpop.f32.mrf.mxu1 }
 0x1c8   : > { %v6994_v53 = vpop.f32.mrf.mxu0  ;;  %7477 = vst [vmem:[#allocation20_spill] sm:$0xff] %v6996_v30 }
 0x1c9   : > { %7476 = vst [vmem:[#allocation19_spill] sm:$0xff] %v6994_v53  ;;  %v7000_v58 = vpop.f32.mrf.mxu1 }
 0x1ca   : > { %v6998_v60 = vpop.f32.mrf.mxu0  ;;  %7479 = vst [vmem:[#allocation22_spill] sm:$0xff] %v7000_v58 }
 0x1cb   : > { %7478 = vst [vmem:[#allocation21_spill] sm:$0xff] %v6998_v60  ;;  %v7004_v54 = vpop.f32.mrf.mxu1 }
 0x1cc   : > { %v7002_v56 = vpop.f32.mrf.mxu0  ;;  %7481 = vst [vmem:[#allocation24_spill] sm:$0xff] %v7004_v54 }
 0x1cd   : > { %7480 = vst [vmem:[#allocation23_spill] sm:$0xff] %v7002_v56  ;;  %v7006_v31 = vpop.f32.mrf.mxu1 }
 0x1ce   : > { %7482 = vst [vmem:[#allocation25_spill] sm:$0xff] %v7006_v31 }
 0x1de   : > { %v4342_v14 = vpop.f32.mrf.mxu0 }
 0x1df   : > { %v7010_v62 = vpop.f32.mrf.mxu1 }
 0x1e0   : > { %v7008_v46 = vpop.f32.mrf.mxu0  ;;  %7484 = vst [vmem:[#allocation27_spill] sm:$0xff] %v7010_v62 }
 0x1e1   : > { %7483 = vst [vmem:[#allocation26_spill] sm:$0xff] %v7008_v46  ;;  %v7014_v53 = vpop.f32.mrf.mxu1 }
 0x1e2   : > { %v7012_v63 = vpop.f32.mrf.mxu0  ;;  %7486 = vst [vmem:[#allocation29_spill] sm:$0xff] %v7014_v53 }
 0x1e3   : > { %7485 = vst [vmem:[#allocation28_spill] sm:$0xff] %v7012_v63  ;;  %v7018_v60 = vpop.f32.mrf.mxu1 }
 0x1e4   : > { %v7016_v30 = vpop.f32.mrf.mxu0  ;;  %7487 = vst [vmem:[#allocation30_spill] sm:$0xff] %v7018_v60  ;;  %v7497_v60 = vmax.f32 %v6849_v27, %v6851_v28  ;;  %v7500_v28 = vmax.f32 %v6879_v40, %v6881_v57 }
 0x1e5   : > { %v7022_v56 = vpop.f32.mrf.mxu1 }
 0x1e6   : > { %v7020_v58 = vpop.f32.mrf.mxu0  ;;  %7489 = vst [vmem:[#allocation32_spill] sm:$0xff] %v7022_v56 }
 0x1e7   : > { %7488 = vst [vmem:[#allocation31_spill] sm:$0xff] %v7020_v58  ;;  %v7024_v54 = vpop.f32.mrf.mxu1  ;;  %v2966_v58 = vmax.f32 %v7497_v60, %v6920_v0  ;;  %v2965_v60 = vmax.f32 %v7500_v28, %v6928_v17  ;;  %v7510_v28 = vld [vmem:[#allocation18_spill] sm:$0xff] }
 0x1e8   : > { %7490 = vst [vmem:[#allocation33_spill] sm:$0xff] %v7024_v54  ;;  %v7026_v5 = vpop.f32.mrf.mxu0  ;;  %v7498_v54 = vmax.f32 %v6861_v48, %v6863_v49 }
 0x1e9   : > { %7491 = vst [vmem:[#allocation34_spill] sm:$0xff] %v7026_v5  ;;  %v7028_v31 = vpop.f32.mrf.mxu1  ;;  %v2981_v40 = vmax.f32 %v2965_v60, %v6938_v22 }
 0x1ea   : > { %7492 = vst [vmem:[#allocation35_spill] sm:$0xff] %v7028_v31  ;;  %v7030_v46 = vpop.f32.mrf.mxu0  ;;  %v2964_v31 = vmax.f32 %v7498_v54, %v6922_v10  ;;  %v7501_v54 = vmax.f32 %v6889_v47, %v6892_v59  ;;  %v7503_v59 = vmax.f32 %v6906_v29, %v6910_v4 }
 0x1eb   : > { %7493 = vst [vmem:[#allocation36_spill] sm:$0xff] %v7030_v46  ;;  %v7032_v62 = vpop.f32.mrf.mxu1 }
 0x1ec   : > { %7494 = vst [vmem:[#allocation37_spill] sm:$0xff] %v7032_v62  ;;  %v7034_v63 = vpop.f32.mrf.mxu0  ;;  %v2982_v62 = vmax.f32 %v2966_v58, %v6926_v13  ;;  %v2980_v27 = vmax.f32 %v2964_v31, %v6930_v18  ;;  %v2970_v58 = vmax.f32 %v7501_v54, %v6932_v9  ;;  %v7506_v31 = vld [vmem:[#allocation16_spill] sm:$0xff] }
 0x1ed   : > { %7495 = vst [vmem:[#allocation38_spill] sm:$0xff] %v7034_v63  ;;  %v7042_v56 = vpop.f32.mrf.mxu1  ;;  %v7499_v63 = vmax.f32 %v6870_v55, %v6872_v51 }
 0x1ee   : > { %v2998_v48 = vmax.f32 %v2982_v62, %v4246_v32  ;;  %v2996_v51 = vmax.f32 %v2980_v27, %v1500_v34  ;;  %v2986_v47 = vmax.f32 %v2970_v58, %v6942_v26  ;;  %v7509_v27 = vld [vmem:[#allocation19_spill] sm:$0xff]  ;;  %v7514_v58 = vld [vmem:[#allocation20_spill] sm:$0xff] }
 0x1f0   : > { %v3014_v57 = vmax.f32 %v2998_v48, %v6954_v37  ;;  %v3002_v22 = vmax.f32 %v2986_v47, %v6960_v38 }
 0x1f2   : > { %v3030_v18 = vmax.f32 %v3014_v57, %v4294_v45 }
 0x1fe   : > { %v7036_v53 = vpop.f32.mrf.mxu0 }
 0x1ff   : > { %7496 = vst [vmem:[#allocation39_spill] sm:$0xff] %v7036_v53  ;;  %v7048_v5 = vpop.f32.mrf.mxu1  ;;  %v2967_v53 = vmax.f32 %v7499_v63, %v6924_v11  ;;  %v7502_v63 = vmax.f32 %v6897_v3, %v6901_v61  ;;  %v3012_v3 = vmax.f32 %v2996_v51, %v6958_v20  ;;  %v2997_v61 = vmax.f32 %v2981_v40, %v6956_v19  ;;  %v7515_v51 = vld [vmem:[#allocation21_spill] sm:$0xff] }
 0x200   : > { %v7050_v46 = vpop.f32.mrf.mxu0  ;;  %v7516_v40 = vld [vmem:[#allocation29_spill] sm:$0xff] }
 0x201   : > { %v7062_v49 = vpop.f32.mrf.mxu1  ;;  %v2983_v55 = vmax.f32 %v2967_v53, %v6934_v21  ;;  %v2968_v10 = vmax.f32 %v7502_v63, %v6936_v12  ;;  %v2971_v53 = vmax.f32 %v7503_v59, %v6940_v25  ;;  %v7504_v21 = vmax.f32 %v6912_v7, %v6916_v8 }
 0x202   : > { %v7068_v0 = vpop.f32.mrf.mxu0  ;;  %v3028_v29 = vmax.f32 %v3012_v3, %v1800_v1  ;;  %v7518_v3 = vld [vmem:[#allocation22_spill] sm:$0xff] }
 0x203   : > { %v2999_v11 = vmax.f32 %v2983_v55, %v6952_v36  ;;  %v7078_v13 = vpop.f32.mrf.mxu1  ;;  %v2984_v9 = vmax.f32 %v2968_v10, %v6946_v16  ;;  %v2969_v12 = vmax.f32 %v7504_v21, %v6944_v15  ;;  %v2987_v25 = vmax.f32 %v2971_v53, %v6948_v33  ;;  %v7520_v21 = vld [vmem:[#allocation31_spill] sm:$0xff] }
 0x204   : > { %v7085_v17 = vpop.f32.mrf.mxu0  ;;  %v3013_v36 = vmax.f32 %v2997_v61, %v6966_v41  ;;  %v3046_v16 = vmax.f32 %v3030_v18, %v6980_v50  ;;  %v3018_v15 = vmax.f32 %v3002_v22, %v6968_v42  ;;  %v3044_v20 = vmax.f32 %v3028_v29, %v6984_v43  ;;  %v7505_v41 = vld [vmem:[#allocation17_spill] sm:$0xff]  ;;  %v7508_v42 = vld [vmem:[#allocation14_spill] sm:$0xff]  ;;  %v7519_v18 = vld [vmem:[#allocation23_spill] sm:$0xff] }
 0x205   : > { %v3015_v26 = vmax.f32 %v2999_v11, %v6962_v6  ;;  %v7096_v4 = vpop.f32.mrf.mxu1  ;;  %v3000_v32 = vmax.f32 %v2984_v9, %v6964_v39  ;;  %v2985_v8 = vmax.f32 %v2969_v12, %v6950_v35  ;;  %v3003_v19 = vmax.f32 %v2987_v25, %v6970_v44  ;;  %v7521_v22 = vld [vmem:[#allocation30_spill] sm:$0xff]  ;;  %v7522_v25 = vld [vmem:[#allocation24_spill] sm:$0xff] }
 0x206   : > { %v4394_v34 = vpop.f32.mrf.mxu0  ;;  %v3029_v33 = vmax.f32 %v3013_v36, %v6986_v2  ;;  %v3062_v38 = vmax.f32 %v3046_v16, %v4342_v14  ;;  %v3034_v45 = vmax.f32 %v3018_v15, %v7505_v41  ;;  %v7511_v14 = vld [vmem:[#allocation27_spill] sm:$0xff]  ;;  %v7523_v36 = vld [vmem:[#allocation34_spill] sm:$0xff]  ;;  %v7527_v41 = vld [vmem:[#allocation36_spill] sm:$0xff] }
 0x207   : > { %v3031_v37 = vmax.f32 %v3015_v26, %v6982_v52  ;;  %v7103_v7 = vpop.f32.mrf.mxu1  ;;  %v3016_v6 = vmax.f32 %v3000_v32, %v6972_v23  ;;  %v3001_v39 = vmax.f32 %v2985_v8, %v6974_v24  ;;  %v7507_v52 = vld [vmem:[#allocation26_spill] sm:$0xff]  ;;  %v3019_v44 = vmax.f32 %v3003_v19, %v7508_v42  ;;  %v7512_v23 = vld [vmem:[#allocation28_spill] sm:$0xff]  ;;  %v7513_v24 = vld [vmem:[#allocation15_spill] sm:$0xff] }
 0x208   : > { %v2416_v1 = vpop.f32.mrf.mxu0  ;;  %v3060_v35 = vmax.f32 %v3044_v20, %v7507_v52  ;;  %v3045_v2 = vmax.f32 %v3029_v33, %v7510_v28  ;;  %v3078_v60 = vmax.f32 %v3062_v38, %v7511_v14  ;;  %v3050_v55 = vmax.f32 %v3034_v45, %v7514_v58  ;;  %v7517_v47 = vld [vmem:[#allocation39_spill] sm:$0xff]  ;;  %v7524_v8 = vld [vmem:[#allocation32_spill] sm:$0xff] }
 0x209   : > { %v3047_v50 = vmax.f32 %v3031_v37, %v7506_v31  ;;  %v7115_v62 = vpop.f32.mrf.mxu1  ;;  %v3032_v43 = vmax.f32 %v3016_v6, %v7509_v27  ;;  %v3017_v54 = vmax.f32 %v3001_v39, %v7513_v24  ;;  %v3035_v63 = vmax.f32 %v3019_v44, %v7515_v51  ;;  %v3889_v37 = vld [vmem:[%s7139_s18 + $0x8] sm:$0xff]   ;;  %v7526_v6 = vld [vmem:[#allocation33_spill] sm:$0xff] }
 0x20a   : > { %v4395_v10 = vpop.f32.mrf.mxu0  ;;  %v3076_v57 = vmax.f32 %v3060_v35, %v7516_v40  ;;  %v3061_v11 = vmax.f32 %v3045_v2, %v7016_v30  ;;  %v3094_v59 = vmax.f32 %v3078_v60, %v7517_v47  ;;  %v3066_v12 = vmax.f32 %v3050_v55, %v7520_v21  ;;  %v7528_v27 = vld [vmem:[#allocation35_spill] sm:$0xff]  ;;  %v3891_v47 = vld [vmem:[%s7139_s18 + $0x18] sm:$0xff]  }
 0x20b   : > { %v3063_v48 = vmax.f32 %v3047_v50, %v7512_v23  ;;  %v7128_v53 = vpop.f32.mrf.mxu1  ;;  %v3048_v61 = vmax.f32 %v3032_v43, %v7518_v3  ;;  %v3033_v9 = vmax.f32 %v3017_v54, %v7519_v18  ;;  %v3051_v32 = vmax.f32 %v3035_v63, %v7522_v25  ;;  %v3874_v50 = vld [vmem:[%s7139_s18] sm:$0xff]  }
 0x20c   : > { %v3092_v29 = vmax.f32 %v3076_v57, %v7050_v46  ;;  %v2419_v30 = vpop.f32.mrf.mxu0  ;;  %v3077_v15 = vmax.f32 %v3061_v11, %v7524_v8  ;;  %v3110_v19 = vmax.f32 %v3094_v59, %v7048_v5  ;;  %v7525_v46 = vld [vmem:[#allocation25_spill] sm:$0xff]  ;;  %v3082_v39 = vmax.f32 %v3066_v12, %v7526_v6  ;;  %v7529_v43 = vld [vmem:[#allocation38_spill] sm:$0xff]  ;;  %v3890_v12 = vld [vmem:[%s7139_s18 + $0x10] sm:$0xff]  }
 0x20d   : > { %v3079_v26 = vmax.f32 %v3063_v48, %v7521_v22  ;;  %v3064_v16 = vmax.f32 %v3048_v61, %v7523_v36  ;;  %v7145_v33 = vpop.f32.mrf.mxu1  ;;  %v3049_v38 = vmax.f32 %v3033_v9, %v7525_v46  ;;  %v3067_v45 = vmax.f32 %v3051_v32, %v7527_v41 }
 0x20e   : > { %v3108_v52 = vmax.f32 %v3092_v29, %v7062_v49  ;;  %v3093_v35 = vmax.f32 %v3077_v15, %v7085_v17  ;;  %v3879_v5 = vunpack.c.l.bf16 %v3889_v37  ;;  %v3098_v2 = vmax.f32 %v3082_v39, %v4394_v34  ;;  %v7530_v49 = vld [vmem:[#allocation37_spill] sm:$0xff] }
 0x20f   : > { %v3095_v20 = vmax.f32 %v3079_v26, %v7068_v0  ;;  %v3080_v0 = vmax.f32 %v3064_v16, %v7528_v27  ;;  %v3065_v28 = vmax.f32 %v3049_v38, %v7529_v43  ;;  %v3875_v54 = vunpack.c.l.bf16 %v3874_v50 }
 0x210   : > { %v3083_v58 = vmax.f32 %v3067_v45, %v7530_v49  ;;  %v3880_v51 = vunpack.c.h.bf16 %v3889_v37  ;;  %v3109_v63 = vmax.f32 %v3093_v35, %v7096_v4  ;;  %v3876_v61 = vunpack.c.h.bf16 %v3874_v50 }
 0x211   : > { %v3111_v60 = vmax.f32 %v3095_v20, %v7078_v13  ;;  %v3096_v17 = vmax.f32 %v3080_v0, %v2416_v1  ;;  %v3081_v59 = vmax.f32 %v3065_v28, %v7042_v56  ;;  %v3114_v13 = vmax.f32 %v3098_v2, %v7103_v7 }
 0x212   : > { %v3099_v18 = vmax.f32 %v3083_v58, %v4395_v10  ;;  %v3887_v56 = vunpack.c.l.bf16 %v3891_v47  ;;  %v3883_v16 = vunpack.c.l.bf16 %v3890_v12 }
 0x213   : > { %v3112_v22 = vmax.f32 %v3096_v17, %v7115_v62  ;;  %v3097_v29 = vmax.f32 %v3081_v59, %v2419_v30  ;;  %v3888_v30 = vunpack.c.h.bf16 %v3891_v47 }
 0x214   : > { %v3115_v37 = vmax.f32 %v3099_v18, %v7128_v53 }
 0x215   : > { %v3113_v46 = vmax.f32 %v3097_v29, %v7145_v33 }
 0x21e   : > { %v4438_v31 = vpop.f32.mrf.mxu0 }
 0x21f   : > { %v3126_v42 = vmax.f32 %v3110_v19, %v4438_v31  ;;  %v4462_v44 = vpop.f32.mrf.mxu1 }
 0x220   : > { %v2700_v14 = vpop.f32.mrf.mxu0 }
 0x221   : > { %v3142_v23 = vmax.f32 %v3126_v42, %v4462_v44  ;;  %v3124_v48 = vmax.f32 %v3108_v52, %v2700_v14  ;;  %v2850_v24 = vpop.f32.mrf.mxu1  ;;  %v3884_v52 = vunpack.c.h.bf16 %v3890_v12 }
 0x222   : > { %v4439_v55 = vpop.f32.mrf.mxu0 }
 0x223   : > { %v3166_v40 = vmax.f32 %v3142_v23, %v3879_v5  ;;  %v3140_v57 = vmax.f32 %v3124_v48, %v2850_v24  ;;  %v3127_v11 = vmax.f32 %v3111_v60, %v4439_v55  ;;  %v4463_v34 = vpop.f32.mrf.mxu1 }
 0x224   : > { %v2703_v3 = vpop.f32.mrf.mxu0 }
 0x225   : > { %3174 = vst [vmem:[%s7162_s23 + $0x10] sm:$0xff] %v3166_v40  ;;  %v3164_v1 = vmax.f32 %v3140_v57, %v3875_v54  ;;  %v3143_v4 = vmax.f32 %v3127_v11, %v4463_v34  ;;  %v3125_v9 = vmax.f32 %v3109_v63, %v2703_v3  ;;  %v2853_v21 = vpop.f32.mrf.mxu1 }
 0x226   : > { %v4442_v26 = vpop.f32.mrf.mxu0 }
 0x227   : > { %3172 = vst [vmem:[%s7162_s23] sm:$0xff] %v3164_v1  ;;  %v3167_v7 = vmax.f32 %v3143_v4, %v3880_v51  ;;  %v3141_v10 = vmax.f32 %v3125_v9, %v2853_v21  ;;  %v3130_v25 = vmax.f32 %v3114_v13, %v4442_v26  ;;  %v4466_v32 = vpop.f32.mrf.mxu1 }
 0x228   : > { %v2716_v36 = vpop.f32.mrf.mxu0 }
 0x229   : > { %3175 = vst [vmem:[%s7162_s23 + $0x18] sm:$0xff] %v3167_v7  ;;  %v3165_v8 = vmax.f32 %v3141_v10, %v3876_v61  ;;  %v3146_v15 = vmax.f32 %v3130_v25, %v4466_v32  ;;  %v3128_v19 = vmax.f32 %v3112_v22, %v2716_v36  ;;  %v2866_v62 = vpop.f32.mrf.mxu1 }
 0x22a   : > { %v4443_v20 = vpop.f32.mrf.mxu0 }
 0x22b   : > { %3173 = vst [vmem:[%s7162_s23 + $0x8] sm:$0xff] %v3165_v8  ;;  %v3170_v38 = vmax.f32 %v3146_v15, %v3887_v56  ;;  %v3144_v6 = vmax.f32 %v3128_v19, %v2866_v62  ;;  %v3131_v39 = vmax.f32 %v3115_v37, %v4443_v20  ;;  %v4467_v41 = vpop.f32.mrf.mxu1 }
 0x22c   : > { %v2719_v53 = vpop.f32.mrf.mxu0 }
 0x22d   : > { %3178 = vst [vmem:[%s7162_s23 + $0x30] sm:$0xff] %v3170_v38  ;;  %v3168_v45 = vmax.f32 %v3144_v6, %v3883_v16  ;;  %v3147_v31 = vmax.f32 %v3131_v39, %v4467_v41  ;;  %v3129_v50 = vmax.f32 %v3113_v46, %v2719_v53  ;;  %v2869_v35 = vpop.f32.mrf.mxu1 }
 0x22f   : > { %3176 = vst [vmem:[%s7162_s23 + $0x20] sm:$0xff] %v3168_v45  ;;  %v3171_v33 = vmax.f32 %v3147_v31, %v3888_v30  ;;  %v3145_v42 = vmax.f32 %v3129_v50, %v2869_v35 }
 0x231   : > { %3179 = vst [vmem:[%s7162_s23 + $0x38] sm:$0xff] %v3171_v33  ;;  %v3169_v44 = vmax.f32 %v3145_v42, %v3884_v52 }
 0x233   : > { %3177 = vst [vmem:[%s7162_s23 + $0x28] sm:$0xff] %v3169_v44 }
 0x234   : > { %4652 = shalt.err (!%p4649_p4)
}
 0x235   : > { %s4653_s7 = scalar_lea.hbm %s7181_s29, 1024  ;;  %s4657_s4 = scalar_lea.hbm %s7234_s3, 2048 }
 0x236   : > { %p4654_p5 = scmp.ne.s32.totalorder %s7181_s29, %s4653_s7  ;;  %p4658_p10 = scmp.lt.s32.totalorder %s7181_s29, %s7234_s3 }
 0x237   : > { %p4659_p13 = scmp.lt.s32.totalorder %s4657_s4, %s4653_s7 }
 0x238   : > { %p4655_p6 = pnand %p4654_p5, %p4811_p9 }
 0x239   : > { %p4660_p8 = por %p4659_p13, %p4658_p10 }
 0x23a   : > { %p4656_p7 = pneg %p4655_p6 }
 0x23c   : > { %p4661_p12 = pnand %p4660_p8, %p4656_p7 }
 0x23e   : > { %4664 = shalt.err (!%p4661_p12)
}
 0x23f   : > { %s4734_s22 = smov 128   ;;  %s4735_s18 = smov 8  }
 0x240   : > { %4474 = dma.vmem_to_hbm [thread:$0]  (%p4811_p9), %s7175_s21, 1024, %s7181_s29, %s3181_s2, %s4734_s22, %s4734_s22, %s4735_s18  }
 0x241 PF: > { %s3210_s24 = sand.u32 1, %s4703_s12   ;;  %p7531_p0 = scmp.ge.s32.totalorder %s4723_s17, 2 }
 0x242   : > { %s3211_s23 = scalar_lea.sflag [#allocation5], %s3210_s24 }
 0x243   : > { %p4487_p1 = pnand %p7531_p0, %p4818_p11 }
 0x245   : > { %p4488_p3 = pneg %p4487_p1 }
 0x247   : > { %4698 = dma.done.wait (%p4488_p3), %s3211_s23, 1024  }
 0x248   : > { %4700 = vsyncadd (%p4488_p3), %s3211_s23, 4294966272  ;;  %s22_s17 = sadd.s32 1, %s4723_s17   ;;  %s7532_s25 = sld [smem:[#allocation13_spill]] }
 0x249   : > { %p19_p2 = scmp.ge.s32.totalorder %s22_s17, 4   ;;  %s7533_s12 = smov %s4707_s13 }
 0x24a   : > { %s7534_s13 = smov %s4711_s14  ;;  %s7535_s14 = smov %s4816_s26 }
 0x24b   : > { %s7536_s15 = smov %s4719_s16  ;;  %21 = sbr.rel (!%p19_p2) target bundleno = 11 (0xb), region = 124 }
 0x24e   : > { %s7537_s16 = smov %s7532_s25 }
 0x250   :  { %3216 = vsyncpa [#allocation4], 1 }
 0x251   :  { %3218 = vsyncpa [#allocation4 + $0x1], 1 }
 0x252   :  { %3219 = vsyncpa [#allocation7], 1 }
 0x253   :  { %3221 = vsyncpa [#allocation7 + $0x1], 1 }
 0x254   :  { %3222 = vsyncpa [#allocation5], 1 }
 0x255   :  { %3224 = vsyncpa [#allocation5 + $0x1], 1 }

</bundles_post_ra>
